<compile_context>
chip_gen: v7x
topology: tpu7x:2x2x1
jax: 0.10.0
libtpu: 0.0.40
codegen_flags: <defaults>
</compile_context>

<pallas_src>
import functools
import math

import jax
import jax.numpy as jnp
from jax import lax
from jax.experimental import pallas as pl
from jax.experimental.pallas import tpu as pltpu

F32 = jnp.float32
BF16 = jnp.bfloat16


# ----------------------------------------------------------------------------
# Fused kernel: [input-proj + PE] -> L x encoder layer -> [pool + MLP head]
# grid = (batch_blocks, num_layers)
# ----------------------------------------------------------------------------
def _fused_discriminator_kernel(
        x_ref, in_w_ref, in_b_ref, pe_ref,
        wqkv_ref, bqkv_ref, wo_ref, bo_ref,
        ln1g_ref, ln1b_ref, w1_ref, b1_ref, w2_ref, b2_ref,
        ln2g_ref, ln2b_ref,
        h1w_ref, h1b_ref, h2w_ref, h2b_ref,
        o_ref,
        h_vmem,
        *, bblk, seq, nhead, num_layers, eps, approx_softmax):
    T = seq
    D = wo_ref.shape[0]
    dh = D // nhead
    scale = 1.0 / math.sqrt(dh)
    l = pl.program_id(1)

    # --- layer-0 prologue: input projection + positional encoding -> scratch
    @pl.when(l == 0)
    def _():
        xb = x_ref[...].astype(BF16)                               # (rows, C)
        y = jnp.dot(xb, in_w_ref[...], preferred_element_type=F32)  # (rows, D)
        h_vmem[...] = y + in_b_ref[...] + pe_ref[...]

    x = h_vmem[...]                                                # (rows, D) f32

    # --- fused Q|K|V projection (batch folded into the MXU M dimension) ---
    qkv = jnp.dot(x.astype(BF16), wqkv_ref[...],
                  preferred_element_type=F32) + bqkv_ref[...]      # (rows, 3D)

    # --- per-batch, per-head softmax attention; lane-dense concat output ---
    # TODO(synk): flash-style (online-softmax) T tiling for long sequences
    #             (O(T*block) VMEM instead of O(T^2)); not needed at T=8.
    ctx_rows = []
    for b in range(bblk):
        qkv_b = qkv[b * T:(b + 1) * T, :]
        head_ctx = []
        for h in range(nhead):
            qh = qkv_b[:, h * dh:(h + 1) * dh].astype(BF16)
            kh = qkv_b[:, D + h * dh:D + (h + 1) * dh].astype(BF16)
            vh = qkv_b[:, 2 * D + h * dh:2 * D + (h + 1) * dh].astype(BF16)
            # contract last dims of q and k -> no explicit kh.T transpose
            s = lax.dot_general(qh, kh, (((1,), (1,)), ((), ())),
                                preferred_element_type=F32) * scale   # (T, T)
            s = s - jnp.max(s, axis=-1, keepdims=True)
            p = jnp.exp(s)
            denom = jnp.sum(p, axis=-1, keepdims=True)
            if approx_softmax:
                p = p * pl.reciprocal(denom, approx=True)
            else:
                p = p / denom
            head_ctx.append(jnp.dot(p.astype(BF16), vh,
                                    preferred_element_type=F32))      # (T, dh)
        ctx_rows.append(jnp.concatenate(head_ctx, axis=-1))           # (T, D)
    ctx = jnp.concatenate(ctx_rows, axis=0)                           # (rows, D)

    attn = jnp.dot(ctx.astype(BF16), wo_ref[...],
                   preferred_element_type=F32) + bo_ref[...]

    # --- residual + layernorm 1 (post-norm, matches norm_first=False) ---
    h1 = x + attn
    mu = jnp.mean(h1, axis=-1, keepdims=True)
    var = jnp.mean((h1 - mu) ** 2, axis=-1, keepdims=True)
    h1 = (h1 - mu) * lax.rsqrt(var + eps) * ln1g_ref[...] + ln1b_ref[...]

    # --- FFN: linear2(relu(linear1(h1))); dropout is an eval no-op ---
    ff = jnp.dot(h1.astype(BF16), w1_ref[...],
                 preferred_element_type=F32) + b1_ref[...]
    ff = jnp.maximum(ff, 0.0)
    ff = jnp.dot(ff.astype(BF16), w2_ref[...],
                 preferred_element_type=F32) + b2_ref[...]

    # --- residual + layernorm 2 ---
    h2 = h1 + ff
    mu = jnp.mean(h2, axis=-1, keepdims=True)
    var = jnp.mean((h2 - mu) ** 2, axis=-1, keepdims=True)
    h2 = (h2 - mu) * lax.rsqrt(var + eps) * ln2g_ref[...] + ln2b_ref[...]

    h_vmem[...] = h2                                  # stays resident in VMEM

    # --- last-layer epilogue: mean over time + Linear + LeakyReLU + Linear ---
    @pl.when(l == num_layers - 1)
    def _():
        pooled = jnp.concatenate(
            [jnp.mean(h2[b * T:(b + 1) * T, :], axis=0, keepdims=True)
             for b in range(bblk)], axis=0)                       # (Bblk, D)
        z = jnp.dot(pooled.astype(BF16), h1w_ref[...],
                    preferred_element_type=F32) + h1b_ref[...]
        z = jnp.where(z > 0, z, 0.2 * z)                          # LeakyReLU(0.2)
        y = jnp.dot(z.astype(BF16), h2w_ref[...],
                    preferred_element_type=F32) + h2b_ref[...]
        o_ref[...] = y.astype(o_ref.dtype)


def _num_batch_blocks(B, T, rows_target=256):
    """Split batch into >=2 'parallel' blocks (feeds both v7x TensorCores) only
    when each block still supplies >= rows_target MXU rows and the (Bblk, 1)
    output block stays tile-legal; otherwise keep one block."""
    best = 1
    for nb in range(2, B + 1):
        if B % nb:
            continue
        bblk = B // nb
        if bblk % 8 == 0 and bblk * T >= rows_target:
            best = nb
    return best


# ----------------------------------------------------------------------------
# Parameters (deterministic synthetic init; QKV pre-fused, layers pre-stacked)
# ----------------------------------------------------------------------------
def make_positional_encoding(max_len, d_model):
    position = jnp.arange(max_len, dtype=F32)[:, None]
    div_term = jnp.exp(jnp.arange(0, d_model, 2, dtype=F32)
                       * (-math.log(10000.0) / d_model))
    pe = jnp.zeros((max_len, d_model), F32)
    pe = pe.at[:, 0::2].set(jnp.sin(position * div_term))
    pe = pe.at[:, 1::2].set(jnp.cos(position * div_term))
    return pe


def init_params(key, input_dim, d_model, nhead, num_layers, max_len=5000):
    ff = 4 * d_model
    dh2 = d_model // 2
    ks = jax.random.split(key, 16)

    def w(k, shape, scale=0.05, dtype=BF16):
        # matmul weights stored in bf16 (MXU-native, halves weight DMA bytes)
        return (scale * jax.random.normal(k, shape, F32)).astype(dtype)

    L = num_layers
    return {
        "in_w": w(ks[0], (input_dim, d_model)),
        "in_b": w(ks[1], (1, d_model), dtype=F32),
        "pe": make_positional_encoding(max_len, d_model),
        # Q|K|V fused: equivalent to concat(wq, wk, wv) along the output dim.
        "wqkv": w(ks[2], (L, d_model, 3 * d_model)),
        "bqkv": w(ks[3], (L, 1, 3 * d_model), dtype=F32),
        "wo": w(ks[4], (L, d_model, d_model)),
        "bo": w(ks[5], (L, 1, d_model), dtype=F32),
        "ln1_g": jnp.ones((L, 1, d_model), F32),
        "ln1_b": jnp.zeros((L, 1, d_model), F32),
        "w1": w(ks[6], (L, d_model, ff)),
        "b1": w(ks[7], (L, 1, ff), dtype=F32),
        "w2": w(ks[8], (L, ff, d_model)),
        "b2": w(ks[9], (L, 1, d_model), dtype=F32),
        "ln2_g": jnp.ones((L, 1, d_model), F32),
        "ln2_b": jnp.zeros((L, 1, d_model), F32),
        "out1_w": w(ks[10], (d_model, dh2)),
        "out1_b": w(ks[11], (1, dh2), dtype=F32),
        "out2_w": w(ks[12], (dh2, 1)),
        "out2_b": w(ks[13], (1, 1), dtype=F32),
    }


# ----------------------------------------------------------------------------
# Forward pass: a single fused pallas_call
# ----------------------------------------------------------------------------
def discriminator_forward(x, params, *, nhead, eps=1e-5, approx_softmax=False):
    """x: (B, input_dim, T)  ->  (B, 1)."""
    B, C, T = x.shape
    D = params["in_w"].shape[1]
    L = params["wqkv"].shape[0]
    FF = params["w1"].shape[2]
    pe = params["pe"]
    assert T <= pe.shape[0], "sequence length exceeds positional-encoding max_len"
    assert D % nhead == 0

    nb = _num_batch_blocks(B, T)
    bblk = B // nb
    rows = bblk * T

    # x.transpose(1, 2) then fold batch into the matmul M dimension.
    x_rows = jnp.transpose(x, (0, 2, 1)).reshape(B * T, C)       # (B*T, C)
    pe_rows = jnp.tile(pe[:T], (bblk, 1))                        # (rows, D)

    def layer_spec(shape):
        return pl.BlockSpec((None,) + tuple(shape[1:]), lambda bb, l: (l, 0, 0))

    def const_spec(shape):
        return pl.BlockSpec(tuple(shape), lambda bb, l: (0, 0))

    operands = [
        x_rows, params["in_w"], params["in_b"], pe_rows,
        params["wqkv"], params["bqkv"], params["wo"], params["bo"],
        params["ln1_g"], params["ln1_b"], params["w1"], params["b1"],
        params["w2"], params["b2"], params["ln2_g"], params["ln2_b"],
        params["out1_w"], params["out1_b"], params["out2_w"], params["out2_b"],
    ]
    in_specs = [
        pl.BlockSpec((rows, C), lambda bb, l: (bb, 0)),          # x row block
        const_spec(params["in_w"].shape),
        const_spec(params["in_b"].shape),
        pl.BlockSpec((rows, D), lambda bb, l: (0, 0)),           # PE (shared)
        layer_spec(params["wqkv"].shape),
        layer_spec(params["bqkv"].shape),
        layer_spec(params["wo"].shape),
        layer_spec(params["bo"].shape),
        layer_spec(params["ln1_g"].shape),
        layer_spec(params["ln1_b"].shape),
        layer_spec(params["w1"].shape),
        layer_spec(params["b1"].shape),
        layer_spec(params["w2"].shape),
        layer_spec(params["b2"].shape),
        layer_spec(params["ln2_g"].shape),
        layer_spec(params["ln2_b"].shape),
        const_spec(params["out1_w"].shape),
        const_spec(params["out1_b"].shape),
        const_spec(params["out2_w"].shape),
        const_spec(params["out2_b"].shape),
    ]

    # Advisory cost estimate for XLA's scheduler around the custom call.
    flops = (2 * B * T * C * D
             + L * (24 * B * T * D * D + 4 * B * T * T * D)
             + 2 * B * D * (D // 2) + 2 * B * (D // 2))
    transcendentals = L * B * nhead * T * T
    bytes_accessed = (sum(int(a.size) * a.dtype.itemsize for a in operands)
                      + B * 1 * 4)

    kernel = functools.partial(
        _fused_discriminator_kernel,
        bblk=bblk, seq=T, nhead=nhead, num_layers=L, eps=eps,
        approx_softmax=approx_softmax)

    return pl.pallas_call(
        kernel,
        out_shape=jax.ShapeDtypeStruct((B, 1), F32),
        grid=(nb, L),
        in_specs=in_specs,
        out_specs=pl.BlockSpec((bblk, 1), lambda bb, l: (bb, 0)),
        scratch_shapes=[pltpu.VMEM((rows, D), F32)],   # h resident across layers
        compiler_params=pltpu.CompilerParams(
            dimension_semantics=("parallel", "arbitrary"),
            vmem_limit_bytes=32 * 1024 * 1024),
        cost_estimate=pl.CostEstimate(flops=flops,
                                      transcendentals=transcendentals,
                                      bytes_accessed=bytes_accessed),
    )(*operands)


# ----------------------------------------------------------------------------
# Demo
# ----------------------------------------------------------------------------
if __name__ == "__main__":
    # Small, module-consistent shapes (x is channels-first like PyTorch).
    B, INPUT_DIM, T = 2, 16, 8
    D_MODEL, NHEAD, NUM_LAYERS = 128, 4, 2

    key_x, key_p = jax.random.split(jax.random.PRNGKey(0))
    x = jax.random.normal(key_x, (B, INPUT_DIM, T), F32)          # (B, C, T)
    params = init_params(key_p, INPUT_DIM, D_MODEL, NHEAD, NUM_LAYERS, max_len=64)

    fwd = jax.jit(functools.partial(discriminator_forward, nhead=NHEAD))
    out = fwd(x, params)
    jax.block_until_ready(out)
    assert out.shape == (B, 1), out.shape
    # TODO(synk): dropout(p=0.1) inside the encoder layers is omitted (inference no-op).
    print("KERNEL_OK")
</pallas_src>

<mosaic_0001>
module attributes {stable_mosaic.version = 11 : i64} {
  func.func @_fused_discriminator_kernel(%arg0: i32, %arg1: i32, %arg2: memref<16x16xf32, #tpu.memory_space<vmem>>, %arg3: memref<16x128xbf16, #tpu.memory_space<vmem>>, %arg4: memref<1x128xf32, #tpu.memory_space<vmem>>, %arg5: memref<16x128xf32, #tpu.memory_space<vmem>>, %arg6: memref<1x128x384xbf16, #tpu.memory_space<vmem>>, %arg7: memref<1x1x384xf32, #tpu.memory_space<vmem>>, %arg8: memref<1x128x128xbf16, #tpu.memory_space<vmem>>, %arg9: memref<1x1x128xf32, #tpu.memory_space<vmem>>, %arg10: memref<1x1x128xf32, #tpu.memory_space<vmem>>, %arg11: memref<1x1x128xf32, #tpu.memory_space<vmem>>, %arg12: memref<1x128x512xbf16, #tpu.memory_space<vmem>>, %arg13: memref<1x1x512xf32, #tpu.memory_space<vmem>>, %arg14: memref<1x512x128xbf16, #tpu.memory_space<vmem>>, %arg15: memref<1x1x128xf32, #tpu.memory_space<vmem>>, %arg16: memref<1x1x128xf32, #tpu.memory_space<vmem>>, %arg17: memref<1x1x128xf32, #tpu.memory_space<vmem>>, %arg18: memref<128x64xbf16, #tpu.memory_space<vmem>>, %arg19: memref<1x64xf32, #tpu.memory_space<vmem>>, %arg20: memref<64x1xbf16, #tpu.memory_space<vmem>>, %arg21: memref<1x1xf32, #tpu.memory_space<vmem>>, %arg22: memref<2x1xf32, #tpu.memory_space<vmem>>, %arg23: memref<16x128xf32, #tpu.memory_space<vmem>>) attributes {dimension_semantics = [#tpu.dimension_semantics<parallel>, #tpu.dimension_semantics<arbitrary>], iteration_bounds = array<i64: 1, 2>, scalar_prefetch = 0 : i64, scratch_operands = 1 : i64, tpu.core_type = #tpu.core_type<tc>, window_params = [{transform_indices = @transform_0, window_bounds = array<i64: 16, 16>}, {pipeline_mode = #tpu.pipeline_mode<synchronous>, transform_indices = @transform_1, window_bounds = array<i64: 16, 128>}, {pipeline_mode = #tpu.pipeline_mode<synchronous>, transform_indices = @transform_2, window_bounds = array<i64: 1, 128>}, {pipeline_mode = #tpu.pipeline_mode<synchronous>, transform_indices = @transform_3, window_bounds = array<i64: 16, 128>}, {transform_indices = @transform_4, window_bounds = array<i64: 1, 128, 384>}, {transform_indices = @transform_5, window_bounds = array<i64: 1, 1, 384>}, {transform_indices = @transform_6, window_bounds = array<i64: 1, 128, 128>}, {transform_indices = @transform_7, window_bounds = array<i64: 1, 1, 128>}, {transform_indices = @transform_8, window_bounds = array<i64: 1, 1, 128>}, {transform_indices = @transform_9, window_bounds = array<i64: 1, 1, 128>}, {transform_indices = @transform_10, window_bounds = array<i64: 1, 128, 512>}, {transform_indices = @transform_11, window_bounds = array<i64: 1, 1, 512>}, {transform_indices = @transform_12, window_bounds = array<i64: 1, 512, 128>}, {transform_indices = @transform_13, window_bounds = array<i64: 1, 1, 128>}, {transform_indices = @transform_14, window_bounds = array<i64: 1, 1, 128>}, {transform_indices = @transform_15, window_bounds = array<i64: 1, 1, 128>}, {pipeline_mode = #tpu.pipeline_mode<synchronous>, transform_indices = @transform_16, window_bounds = array<i64: 128, 64>}, {pipeline_mode = #tpu.pipeline_mode<synchronous>, transform_indices = @transform_17, window_bounds = array<i64: 1, 64>}, {pipeline_mode = #tpu.pipeline_mode<synchronous>, transform_indices = @transform_18, window_bounds = array<i64: 64, 1>}, {pipeline_mode = #tpu.pipeline_mode<synchronous>, transform_indices = @transform_19, window_bounds = array<i64: 1, 1>}, {transform_indices = @transform_20, window_bounds = array<i64: 2, 1>}]} {
    %c0_i32 = arith.constant 0 : i32
    %0 = arith.cmpi eq, %arg1, %c0_i32 : i32
    %1 = arith.extui %0 : i1 to i32
    %c0_i32_0 = arith.constant 0 : i32
    %2 = arith.cmpi ne, %1, %c0_i32_0 : i32
    scf.if %2 {
      %c0_95 = arith.constant 0 : index
      %c0_96 = arith.constant 0 : index
      %261 = vector.load %arg2[%c0_95, %c0_96] : memref<16x16xf32, #tpu.memory_space<vmem>>, vector<16x16xf32>
      %262 = arith.truncf %261 : vector<16x16xf32> to vector<16x16xbf16>
      %c0_97 = arith.constant 0 : index
      %c0_98 = arith.constant 0 : index
      %263 = vector.load %arg3[%c0_97, %c0_98] : memref<16x128xbf16, #tpu.memory_space<vmem>>, vector<16x128xbf16>
      %cst_99 = arith.constant dense<0.000000e+00> : vector<16x128xf32>
      %264 = tpu.matmul %262, %263, %cst_99 {dimension_numbers = #tpu.dot_dimension_numbers<[1], [0], [0], [1], [0, 0, 1, 1], [], []>} : vector<16x16xbf16>, vector<16x128xbf16>, vector<16x128xf32> -> vector<16x128xf32>
      %c0_100 = arith.constant 0 : index
      %c0_101 = arith.constant 0 : index
      %265 = vector.load %arg4[%c0_100, %c0_101] : memref<1x128xf32, #tpu.memory_space<vmem>>, vector<1x128xf32>
      %266 = vector.broadcast %265 : vector<1x128xf32> to vector<16x128xf32>
      %267 = arith.addf %264, %266 : vector<16x128xf32>
      %c0_102 = arith.constant 0 : index
      %c0_103 = arith.constant 0 : index
      %268 = vector.load %arg5[%c0_102, %c0_103] : memref<16x128xf32, #tpu.memory_space<vmem>>, vector<16x128xf32>
      %269 = arith.addf %267, %268 : vector<16x128xf32>
      %c0_104 = arith.constant 0 : index
      %c0_105 = arith.constant 0 : index
      %270 = vector.load %arg23[%c0_104, %c0_105] : memref<16x128xf32, #tpu.memory_space<vmem>>, vector<16x128xf32>
      tpu.vector_store %arg23[%c0_104, %c0_105], %269 {strides = array<i32>} : memref<16x128xf32, #tpu.memory_space<vmem>>, vector<16x128xf32>,
    } else {
    }
    %c0 = arith.constant 0 : index
    %c0_1 = arith.constant 0 : index
    %3 = vector.load %arg23[%c0, %c0_1] : memref<16x128xf32, #tpu.memory_space<vmem>>, vector<16x128xf32>
    %4 = arith.truncf %3 : vector<16x128xf32> to vector<16x128xbf16>
    %c0_2 = arith.constant 0 : index
    %c0_3 = arith.constant 0 : index
    %c0_4 = arith.constant 0 : index
    %5 = vector.load %arg6[%c0_2, %c0_3, %c0_4] : memref<1x128x384xbf16, #tpu.memory_space<vmem>>, vector<1x128x384xbf16>
    %6 = vector.shape_cast %5 : vector<1x128x384xbf16> to vector<128x384xbf16>
    %cst = arith.constant dense<0.000000e+00> : vector<16x384xf32>
    %7 = tpu.matmul %4, %6, %cst {dimension_numbers = #tpu.dot_dimension_numbers<[1], [0], [0], [1], [0, 0, 1, 1], [], []>} : vector<16x128xbf16>, vector<128x384xbf16>, vector<16x384xf32> -> vector<16x384xf32>
    %c0_5 = arith.constant 0 : index
    %c0_6 = arith.constant 0 : index
    %c0_7 = arith.constant 0 : index
    %8 = vector.load %arg7[%c0_5, %c0_6, %c0_7] : memref<1x1x384xf32, #tpu.memory_space<vmem>>, vector<1x1x384xf32>
    %9 = vector.shape_cast %8 : vector<1x1x384xf32> to vector<1x384xf32>
    %10 = vector.broadcast %9 : vector<1x384xf32> to vector<16x384xf32>
    %11 = arith.addf %7, %10 : vector<16x384xf32>
    %12 = vector.extract_strided_slice %11 {offsets = [0, 0], sizes = [8, 384], strides = [1, 1]} : vector<16x384xf32> to vector<8x384xf32>
    %13 = vector.extract_strided_slice %12 {offsets = [0, 0], sizes = [8, 32], strides = [1, 1]} : vector<8x384xf32> to vector<8x32xf32>
    %14 = arith.truncf %13 : vector<8x32xf32> to vector<8x32xbf16>
    %15 = vector.extract_strided_slice %12 {offsets = [0, 128], sizes = [8, 32], strides = [1, 1]} : vector<8x384xf32> to vector<8x32xf32>
    %16 = arith.truncf %15 : vector<8x32xf32> to vector<8x32xbf16>
    %17 = vector.extract_strided_slice %12 {offsets = [0, 256], sizes = [8, 32], strides = [1, 1]} : vector<8x384xf32> to vector<8x32xf32>
    %18 = arith.truncf %17 : vector<8x32xf32> to vector<8x32xbf16>
    %cst_8 = arith.constant dense<0.000000e+00> : vector<8x8xf32>
    %19 = tpu.matmul %14, %16, %cst_8 {dimension_numbers = #tpu.dot_dimension_numbers<[1], [1], [0], [0], [0, 0, 1, 0], [], []>} : vector<8x32xbf16>, vector<8x32xbf16>, vector<8x8xf32> -> vector<8x8xf32>
    %cst_9 = arith.constant 0.176776692 : f32
    %20 = vector.broadcast %cst_9 : f32 to vector<8x8xf32>
    %21 = arith.mulf %19, %20 : vector<8x8xf32>
    %cst_10 = arith.constant dense<0xFF800000> : vector<8xf32>
    %22 = vector.multi_reduction <maximumf>, %21, %cst_10 [1] : vector<8x8xf32> to vector<8xf32>
    %23 = vector.shape_cast %22 : vector<8xf32> to vector<8x1xf32>
    %24 = vector.broadcast %23 : vector<8x1xf32> to vector<8x8xf32>
    %25 = arith.subf %21, %24 : vector<8x8xf32>
    %26 = math.exp %25 : vector<8x8xf32>
    %cst_11 = arith.constant dense<0.000000e+00> : vector<8xf32>
    %27 = vector.multi_reduction <add>, %26, %cst_11 [1] : vector<8x8xf32> to vector<8xf32>
    %28 = vector.shape_cast %27 : vector<8xf32> to vector<8x1xf32>
    %29 = vector.broadcast %28 : vector<8x1xf32> to vector<8x8xf32>
    %30 = arith.divf %26, %29 : vector<8x8xf32>
    %31 = arith.truncf %30 : vector<8x8xf32> to vector<8x8xbf16>
    %cst_12 = arith.constant dense<0.000000e+00> : vector<8x32xf32>
    %32 = tpu.matmul %31, %18, %cst_12 {dimension_numbers = #tpu.dot_dimension_numbers<[1], [0], [0], [1], [0, 0, 1, 1], [], []>} : vector<8x8xbf16>, vector<8x32xbf16>, vector<8x32xf32> -> vector<8x32xf32>
    %33 = vector.extract_strided_slice %12 {offsets = [0, 32], sizes = [8, 32], strides = [1, 1]} : vector<8x384xf32> to vector<8x32xf32>
    %34 = arith.truncf %33 : vector<8x32xf32> to vector<8x32xbf16>
    %35 = vector.extract_strided_slice %12 {offsets = [0, 160], sizes = [8, 32], strides = [1, 1]} : vector<8x384xf32> to vector<8x32xf32>
    %36 = arith.truncf %35 : vector<8x32xf32> to vector<8x32xbf16>
    %37 = vector.extract_strided_slice %12 {offsets = [0, 288], sizes = [8, 32], strides = [1, 1]} : vector<8x384xf32> to vector<8x32xf32>
    %38 = arith.truncf %37 : vector<8x32xf32> to vector<8x32xbf16>
    %cst_13 = arith.constant dense<0.000000e+00> : vector<8x8xf32>
    %39 = tpu.matmul %34, %36, %cst_13 {dimension_numbers = #tpu.dot_dimension_numbers<[1], [1], [0], [0], [0, 0, 1, 0], [], []>} : vector<8x32xbf16>, vector<8x32xbf16>, vector<8x8xf32> -> vector<8x8xf32>
    %cst_14 = arith.constant 0.176776692 : f32
    %40 = vector.broadcast %cst_14 : f32 to vector<8x8xf32>
    %41 = arith.mulf %39, %40 : vector<8x8xf32>
    %cst_15 = arith.constant dense<0xFF800000> : vector<8xf32>
    %42 = vector.multi_reduction <maximumf>, %41, %cst_15 [1] : vector<8x8xf32> to vector<8xf32>
    %43 = vector.shape_cast %42 : vector<8xf32> to vector<8x1xf32>
    %44 = vector.broadcast %43 : vector<8x1xf32> to vector<8x8xf32>
    %45 = arith.subf %41, %44 : vector<8x8xf32>
    %46 = math.exp %45 : vector<8x8xf32>
    %cst_16 = arith.constant dense<0.000000e+00> : vector<8xf32>
    %47 = vector.multi_reduction <add>, %46, %cst_16 [1] : vector<8x8xf32> to vector<8xf32>
    %48 = vector.shape_cast %47 : vector<8xf32> to vector<8x1xf32>
    %49 = vector.broadcast %48 : vector<8x1xf32> to vector<8x8xf32>
    %50 = arith.divf %46, %49 : vector<8x8xf32>
    %51 = arith.truncf %50 : vector<8x8xf32> to vector<8x8xbf16>
    %cst_17 = arith.constant dense<0.000000e+00> : vector<8x32xf32>
    %52 = tpu.matmul %51, %38, %cst_17 {dimension_numbers = #tpu.dot_dimension_numbers<[1], [0], [0], [1], [0, 0, 1, 1], [], []>} : vector<8x8xbf16>, vector<8x32xbf16>, vector<8x32xf32> -> vector<8x32xf32>
    %53 = vector.extract_strided_slice %12 {offsets = [0, 64], sizes = [8, 32], strides = [1, 1]} : vector<8x384xf32> to vector<8x32xf32>
    %54 = arith.truncf %53 : vector<8x32xf32> to vector<8x32xbf16>
    %55 = vector.extract_strided_slice %12 {offsets = [0, 192], sizes = [8, 32], strides = [1, 1]} : vector<8x384xf32> to vector<8x32xf32>
    %56 = arith.truncf %55 : vector<8x32xf32> to vector<8x32xbf16>
    %57 = vector.extract_strided_slice %12 {offsets = [0, 320], sizes = [8, 32], strides = [1, 1]} : vector<8x384xf32> to vector<8x32xf32>
    %58 = arith.truncf %57 : vector<8x32xf32> to vector<8x32xbf16>
    %cst_18 = arith.constant dense<0.000000e+00> : vector<8x8xf32>
    %59 = tpu.matmul %54, %56, %cst_18 {dimension_numbers = #tpu.dot_dimension_numbers<[1], [1], [0], [0], [0, 0, 1, 0], [], []>} : vector<8x32xbf16>, vector<8x32xbf16>, vector<8x8xf32> -> vector<8x8xf32>
    %cst_19 = arith.constant 0.176776692 : f32
    %60 = vector.broadcast %cst_19 : f32 to vector<8x8xf32>
    %61 = arith.mulf %59, %60 : vector<8x8xf32>
    %cst_20 = arith.constant dense<0xFF800000> : vector<8xf32>
    %62 = vector.multi_reduction <maximumf>, %61, %cst_20 [1] : vector<8x8xf32> to vector<8xf32>
    %63 = vector.shape_cast %62 : vector<8xf32> to vector<8x1xf32>
    %64 = vector.broadcast %63 : vector<8x1xf32> to vector<8x8xf32>
    %65 = arith.subf %61, %64 : vector<8x8xf32>
    %66 = math.exp %65 : vector<8x8xf32>
    %cst_21 = arith.constant dense<0.000000e+00> : vector<8xf32>
    %67 = vector.multi_reduction <add>, %66, %cst_21 [1] : vector<8x8xf32> to vector<8xf32>
    %68 = vector.shape_cast %67 : vector<8xf32> to vector<8x1xf32>
    %69 = vector.broadcast %68 : vector<8x1xf32> to vector<8x8xf32>
    %70 = arith.divf %66, %69 : vector<8x8xf32>
    %71 = arith.truncf %70 : vector<8x8xf32> to vector<8x8xbf16>
    %cst_22 = arith.constant dense<0.000000e+00> : vector<8x32xf32>
    %72 = tpu.matmul %71, %58, %cst_22 {dimension_numbers = #tpu.dot_dimension_numbers<[1], [0], [0], [1], [0, 0, 1, 1], [], []>} : vector<8x8xbf16>, vector<8x32xbf16>, vector<8x32xf32> -> vector<8x32xf32>
    %73 = vector.extract_strided_slice %12 {offsets = [0, 96], sizes = [8, 32], strides = [1, 1]} : vector<8x384xf32> to vector<8x32xf32>
    %74 = arith.truncf %73 : vector<8x32xf32> to vector<8x32xbf16>
    %75 = vector.extract_strided_slice %12 {offsets = [0, 224], sizes = [8, 32], strides = [1, 1]} : vector<8x384xf32> to vector<8x32xf32>
    %76 = arith.truncf %75 : vector<8x32xf32> to vector<8x32xbf16>
    %77 = vector.extract_strided_slice %12 {offsets = [0, 352], sizes = [8, 32], strides = [1, 1]} : vector<8x384xf32> to vector<8x32xf32>
    %78 = arith.truncf %77 : vector<8x32xf32> to vector<8x32xbf16>
    %cst_23 = arith.constant dense<0.000000e+00> : vector<8x8xf32>
    %79 = tpu.matmul %74, %76, %cst_23 {dimension_numbers = #tpu.dot_dimension_numbers<[1], [1], [0], [0], [0, 0, 1, 0], [], []>} : vector<8x32xbf16>, vector<8x32xbf16>, vector<8x8xf32> -> vector<8x8xf32>
    %cst_24 = arith.constant 0.176776692 : f32
    %80 = vector.broadcast %cst_24 : f32 to vector<8x8xf32>
    %81 = arith.mulf %79, %80 : vector<8x8xf32>
    %cst_25 = arith.constant dense<0xFF800000> : vector<8xf32>
    %82 = vector.multi_reduction <maximumf>, %81, %cst_25 [1] : vector<8x8xf32> to vector<8xf32>
    %83 = vector.shape_cast %82 : vector<8xf32> to vector<8x1xf32>
    %84 = vector.broadcast %83 : vector<8x1xf32> to vector<8x8xf32>
    %85 = arith.subf %81, %84 : vector<8x8xf32>
    %86 = math.exp %85 : vector<8x8xf32>
    %cst_26 = arith.constant dense<0.000000e+00> : vector<8xf32>
    %87 = vector.multi_reduction <add>, %86, %cst_26 [1] : vector<8x8xf32> to vector<8xf32>
    %88 = vector.shape_cast %87 : vector<8xf32> to vector<8x1xf32>
    %89 = vector.broadcast %88 : vector<8x1xf32> to vector<8x8xf32>
    %90 = arith.divf %86, %89 : vector<8x8xf32>
    %91 = arith.truncf %90 : vector<8x8xf32> to vector<8x8xbf16>
    %cst_27 = arith.constant dense<0.000000e+00> : vector<8x32xf32>
    %92 = tpu.matmul %91, %78, %cst_27 {dimension_numbers = #tpu.dot_dimension_numbers<[1], [0], [0], [1], [0, 0, 1, 1], [], []>} : vector<8x8xbf16>, vector<8x32xbf16>, vector<8x32xf32> -> vector<8x32xf32>
    %93 = tpu.concatenate %32, %52, %72, %92 in 1 : vector<8x32xf32>, vector<8x32xf32>, vector<8x32xf32>, vector<8x32xf32> -> vector<8x128xf32>
    %94 = vector.extract_strided_slice %11 {offsets = [8, 0], sizes = [8, 384], strides = [1, 1]} : vector<16x384xf32> to vector<8x384xf32>
    %95 = vector.extract_strided_slice %94 {offsets = [0, 0], sizes = [8, 32], strides = [1, 1]} : vector<8x384xf32> to vector<8x32xf32>
    %96 = arith.truncf %95 : vector<8x32xf32> to vector<8x32xbf16>
    %97 = vector.extract_strided_slice %94 {offsets = [0, 128], sizes = [8, 32], strides = [1, 1]} : vector<8x384xf32> to vector<8x32xf32>
    %98 = arith.truncf %97 : vector<8x32xf32> to vector<8x32xbf16>
    %99 = vector.extract_strided_slice %94 {offsets = [0, 256], sizes = [8, 32], strides = [1, 1]} : vector<8x384xf32> to vector<8x32xf32>
    %100 = arith.truncf %99 : vector<8x32xf32> to vector<8x32xbf16>
    %cst_28 = arith.constant dense<0.000000e+00> : vector<8x8xf32>
    %101 = tpu.matmul %96, %98, %cst_28 {dimension_numbers = #tpu.dot_dimension_numbers<[1], [1], [0], [0], [0, 0, 1, 0], [], []>} : vector<8x32xbf16>, vector<8x32xbf16>, vector<8x8xf32> -> vector<8x8xf32>
    %cst_29 = arith.constant 0.176776692 : f32
    %102 = vector.broadcast %cst_29 : f32 to vector<8x8xf32>
    %103 = arith.mulf %101, %102 : vector<8x8xf32>
    %cst_30 = arith.constant dense<0xFF800000> : vector<8xf32>
    %104 = vector.multi_reduction <maximumf>, %103, %cst_30 [1] : vector<8x8xf32> to vector<8xf32>
    %105 = vector.shape_cast %104 : vector<8xf32> to vector<8x1xf32>
    %106 = vector.broadcast %105 : vector<8x1xf32> to vector<8x8xf32>
    %107 = arith.subf %103, %106 : vector<8x8xf32>
    %108 = math.exp %107 : vector<8x8xf32>
    %cst_31 = arith.constant dense<0.000000e+00> : vector<8xf32>
    %109 = vector.multi_reduction <add>, %108, %cst_31 [1] : vector<8x8xf32> to vector<8xf32>
    %110 = vector.shape_cast %109 : vector<8xf32> to vector<8x1xf32>
    %111 = vector.broadcast %110 : vector<8x1xf32> to vector<8x8xf32>
    %112 = arith.divf %108, %111 : vector<8x8xf32>
    %113 = arith.truncf %112 : vector<8x8xf32> to vector<8x8xbf16>
    %cst_32 = arith.constant dense<0.000000e+00> : vector<8x32xf32>
    %114 = tpu.matmul %113, %100, %cst_32 {dimension_numbers = #tpu.dot_dimension_numbers<[1], [0], [0], [1], [0, 0, 1, 1], [], []>} : vector<8x8xbf16>, vector<8x32xbf16>, vector<8x32xf32> -> vector<8x32xf32>
    %115 = vector.extract_strided_slice %94 {offsets = [0, 32], sizes = [8, 32], strides = [1, 1]} : vector<8x384xf32> to vector<8x32xf32>
    %116 = arith.truncf %115 : vector<8x32xf32> to vector<8x32xbf16>
    %117 = vector.extract_strided_slice %94 {offsets = [0, 160], sizes = [8, 32], strides = [1, 1]} : vector<8x384xf32> to vector<8x32xf32>
    %118 = arith.truncf %117 : vector<8x32xf32> to vector<8x32xbf16>
    %119 = vector.extract_strided_slice %94 {offsets = [0, 288], sizes = [8, 32], strides = [1, 1]} : vector<8x384xf32> to vector<8x32xf32>
    %120 = arith.truncf %119 : vector<8x32xf32> to vector<8x32xbf16>
    %cst_33 = arith.constant dense<0.000000e+00> : vector<8x8xf32>
    %121 = tpu.matmul %116, %118, %cst_33 {dimension_numbers = #tpu.dot_dimension_numbers<[1], [1], [0], [0], [0, 0, 1, 0], [], []>} : vector<8x32xbf16>, vector<8x32xbf16>, vector<8x8xf32> -> vector<8x8xf32>
    %cst_34 = arith.constant 0.176776692 : f32
    %122 = vector.broadcast %cst_34 : f32 to vector<8x8xf32>
    %123 = arith.mulf %121, %122 : vector<8x8xf32>
    %cst_35 = arith.constant dense<0xFF800000> : vector<8xf32>
    %124 = vector.multi_reduction <maximumf>, %123, %cst_35 [1] : vector<8x8xf32> to vector<8xf32>
    %125 = vector.shape_cast %124 : vector<8xf32> to vector<8x1xf32>
    %126 = vector.broadcast %125 : vector<8x1xf32> to vector<8x8xf32>
    %127 = arith.subf %123, %126 : vector<8x8xf32>
    %128 = math.exp %127 : vector<8x8xf32>
    %cst_36 = arith.constant dense<0.000000e+00> : vector<8xf32>
    %129 = vector.multi_reduction <add>, %128, %cst_36 [1] : vector<8x8xf32> to vector<8xf32>
    %130 = vector.shape_cast %129 : vector<8xf32> to vector<8x1xf32>
    %131 = vector.broadcast %130 : vector<8x1xf32> to vector<8x8xf32>
    %132 = arith.divf %128, %131 : vector<8x8xf32>
    %133 = arith.truncf %132 : vector<8x8xf32> to vector<8x8xbf16>
    %cst_37 = arith.constant dense<0.000000e+00> : vector<8x32xf32>
    %134 = tpu.matmul %133, %120, %cst_37 {dimension_numbers = #tpu.dot_dimension_numbers<[1], [0], [0], [1], [0, 0, 1, 1], [], []>} : vector<8x8xbf16>, vector<8x32xbf16>, vector<8x32xf32> -> vector<8x32xf32>
    %135 = vector.extract_strided_slice %94 {offsets = [0, 64], sizes = [8, 32], strides = [1, 1]} : vector<8x384xf32> to vector<8x32xf32>
    %136 = arith.truncf %135 : vector<8x32xf32> to vector<8x32xbf16>
    %137 = vector.extract_strided_slice %94 {offsets = [0, 192], sizes = [8, 32], strides = [1, 1]} : vector<8x384xf32> to vector<8x32xf32>
    %138 = arith.truncf %137 : vector<8x32xf32> to vector<8x32xbf16>
    %139 = vector.extract_strided_slice %94 {offsets = [0, 320], sizes = [8, 32], strides = [1, 1]} : vector<8x384xf32> to vector<8x32xf32>
    %140 = arith.truncf %139 : vector<8x32xf32> to vector<8x32xbf16>
    %cst_38 = arith.constant dense<0.000000e+00> : vector<8x8xf32>
    %141 = tpu.matmul %136, %138, %cst_38 {dimension_numbers = #tpu.dot_dimension_numbers<[1], [1], [0], [0], [0, 0, 1, 0], [], []>} : vector<8x32xbf16>, vector<8x32xbf16>, vector<8x8xf32> -> vector<8x8xf32>
    %cst_39 = arith.constant 0.176776692 : f32
    %142 = vector.broadcast %cst_39 : f32 to vector<8x8xf32>
    %143 = arith.mulf %141, %142 : vector<8x8xf32>
    %cst_40 = arith.constant dense<0xFF800000> : vector<8xf32>
    %144 = vector.multi_reduction <maximumf>, %143, %cst_40 [1] : vector<8x8xf32> to vector<8xf32>
    %145 = vector.shape_cast %144 : vector<8xf32> to vector<8x1xf32>
    %146 = vector.broadcast %145 : vector<8x1xf32> to vector<8x8xf32>
    %147 = arith.subf %143, %146 : vector<8x8xf32>
    %148 = math.exp %147 : vector<8x8xf32>
    %cst_41 = arith.constant dense<0.000000e+00> : vector<8xf32>
    %149 = vector.multi_reduction <add>, %148, %cst_41 [1] : vector<8x8xf32> to vector<8xf32>
    %150 = vector.shape_cast %149 : vector<8xf32> to vector<8x1xf32>
    %151 = vector.broadcast %150 : vector<8x1xf32> to vector<8x8xf32>
    %152 = arith.divf %148, %151 : vector<8x8xf32>
    %153 = arith.truncf %152 : vector<8x8xf32> to vector<8x8xbf16>
    %cst_42 = arith.constant dense<0.000000e+00> : vector<8x32xf32>
    %154 = tpu.matmul %153, %140, %cst_42 {dimension_numbers = #tpu.dot_dimension_numbers<[1], [0], [0], [1], [0, 0, 1, 1], [], []>} : vector<8x8xbf16>, vector<8x32xbf16>, vector<8x32xf32> -> vector<8x32xf32>
    %155 = vector.extract_strided_slice %94 {offsets = [0, 96], sizes = [8, 32], strides = [1, 1]} : vector<8x384xf32> to vector<8x32xf32>
    %156 = arith.truncf %155 : vector<8x32xf32> to vector<8x32xbf16>
    %157 = vector.extract_strided_slice %94 {offsets = [0, 224], sizes = [8, 32], strides = [1, 1]} : vector<8x384xf32> to vector<8x32xf32>
    %158 = arith.truncf %157 : vector<8x32xf32> to vector<8x32xbf16>
    %159 = vector.extract_strided_slice %94 {offsets = [0, 352], sizes = [8, 32], strides = [1, 1]} : vector<8x384xf32> to vector<8x32xf32>
    %160 = arith.truncf %159 : vector<8x32xf32> to vector<8x32xbf16>
    %cst_43 = arith.constant dense<0.000000e+00> : vector<8x8xf32>
    %161 = tpu.matmul %156, %158, %cst_43 {dimension_numbers = #tpu.dot_dimension_numbers<[1], [1], [0], [0], [0, 0, 1, 0], [], []>} : vector<8x32xbf16>, vector<8x32xbf16>, vector<8x8xf32> -> vector<8x8xf32>
    %cst_44 = arith.constant 0.176776692 : f32
    %162 = vector.broadcast %cst_44 : f32 to vector<8x8xf32>
    %163 = arith.mulf %161, %162 : vector<8x8xf32>
    %cst_45 = arith.constant dense<0xFF800000> : vector<8xf32>
    %164 = vector.multi_reduction <maximumf>, %163, %cst_45 [1] : vector<8x8xf32> to vector<8xf32>
    %165 = vector.shape_cast %164 : vector<8xf32> to vector<8x1xf32>
    %166 = vector.broadcast %165 : vector<8x1xf32> to vector<8x8xf32>
    %167 = arith.subf %163, %166 : vector<8x8xf32>
    %168 = math.exp %167 : vector<8x8xf32>
    %cst_46 = arith.constant dense<0.000000e+00> : vector<8xf32>
    %169 = vector.multi_reduction <add>, %168, %cst_46 [1] : vector<8x8xf32> to vector<8xf32>
    %170 = vector.shape_cast %169 : vector<8xf32> to vector<8x1xf32>
    %171 = vector.broadcast %170 : vector<8x1xf32> to vector<8x8xf32>
    %172 = arith.divf %168, %171 : vector<8x8xf32>
    %173 = arith.truncf %172 : vector<8x8xf32> to vector<8x8xbf16>
    %cst_47 = arith.constant dense<0.000000e+00> : vector<8x32xf32>
    %174 = tpu.matmul %173, %160, %cst_47 {dimension_numbers = #tpu.dot_dimension_numbers<[1], [0], [0], [1], [0, 0, 1, 1], [], []>} : vector<8x8xbf16>, vector<8x32xbf16>, vector<8x32xf32> -> vector<8x32xf32>
    %175 = tpu.concatenate %114, %134, %154, %174 in 1 : vector<8x32xf32>, vector<8x32xf32>, vector<8x32xf32>, vector<8x32xf32> -> vector<8x128xf32>
    %176 = tpu.concatenate %93, %175 in 0 : vector<8x128xf32>, vector<8x128xf32> -> vector<16x128xf32>
    %177 = arith.truncf %176 : vector<16x128xf32> to vector<16x128xbf16>
    %c0_48 = arith.constant 0 : index
    %c0_49 = arith.constant 0 : index
    %c0_50 = arith.constant 0 : index
    %178 = vector.load %arg8[%c0_48, %c0_49, %c0_50] : memref<1x128x128xbf16, #tpu.memory_space<vmem>>, vector<1x128x128xbf16>
    %179 = vector.shape_cast %178 : vector<1x128x128xbf16> to vector<128x128xbf16>
    %cst_51 = arith.constant dense<0.000000e+00> : vector<16x128xf32>
    %180 = tpu.matmul %177, %179, %cst_51 {dimension_numbers = #tpu.dot_dimension_numbers<[1], [0], [0], [1], [0, 0, 1, 1], [], []>} : vector<16x128xbf16>, vector<128x128xbf16>, vector<16x128xf32> -> vector<16x128xf32>
    %c0_52 = arith.constant 0 : index
    %c0_53 = arith.constant 0 : index
    %c0_54 = arith.constant 0 : index
    %181 = vector.load %arg9[%c0_52, %c0_53, %c0_54] : memref<1x1x128xf32, #tpu.memory_space<vmem>>, vector<1x1x128xf32>
    %182 = vector.shape_cast %181 : vector<1x1x128xf32> to vector<1x128xf32>
    %183 = vector.broadcast %182 : vector<1x128xf32> to vector<16x128xf32>
    %184 = arith.addf %180, %183 : vector<16x128xf32>
    %185 = arith.addf %3, %184 : vector<16x128xf32>
    %cst_55 = arith.constant dense<0.000000e+00> : vector<16xf32>
    %186 = vector.multi_reduction <add>, %185, %cst_55 [1] : vector<16x128xf32> to vector<16xf32>
    %187 = vector.shape_cast %186 : vector<16xf32> to vector<16x1xf32>
    %cst_56 = arith.constant 1.280000e+02 : f32
    %188 = vector.broadcast %cst_56 : f32 to vector<16x1xf32>
    %189 = arith.divf %187, %188 : vector<16x1xf32>
    %190 = vector.broadcast %189 : vector<16x1xf32> to vector<16x128xf32>
    %191 = arith.subf %185, %190 : vector<16x128xf32>
    %192 = arith.mulf %191, %191 : vector<16x128xf32>
    %cst_57 = arith.constant dense<0.000000e+00> : vector<16xf32>
    %193 = vector.multi_reduction <add>, %192, %cst_57 [1] : vector<16x128xf32> to vector<16xf32>
    %194 = vector.shape_cast %193 : vector<16xf32> to vector<16x1xf32>
    %cst_58 = arith.constant 1.280000e+02 : f32
    %195 = vector.broadcast %cst_58 : f32 to vector<16x1xf32>
    %196 = arith.divf %194, %195 : vector<16x1xf32>
    %197 = vector.broadcast %189 : vector<16x1xf32> to vector<16x128xf32>
    %198 = arith.subf %185, %197 : vector<16x128xf32>
    %cst_59 = arith.constant 9.99999974E-6 : f32
    %199 = vector.broadcast %cst_59 : f32 to vector<16x1xf32>
    %200 = arith.addf %196, %199 : vector<16x1xf32>
    %201 = math.rsqrt %200 : vector<16x1xf32>
    %202 = vector.broadcast %201 : vector<16x1xf32> to vector<16x128xf32>
    %203 = arith.mulf %198, %202 : vector<16x128xf32>
    %c0_60 = arith.constant 0 : index
    %c0_61 = arith.constant 0 : index
    %c0_62 = arith.constant 0 : index
    %204 = vector.load %arg10[%c0_60, %c0_61, %c0_62] : memref<1x1x128xf32, #tpu.memory_space<vmem>>, vector<1x1x128xf32>
    %205 = vector.shape_cast %204 : vector<1x1x128xf32> to vector<1x128xf32>
    %206 = vector.broadcast %205 : vector<1x128xf32> to vector<16x128xf32>
    %207 = arith.mulf %203, %206 : vector<16x128xf32>
    %c0_63 = arith.constant 0 : index
    %c0_64 = arith.constant 0 : index
    %c0_65 = arith.constant 0 : index
    %208 = vector.load %arg11[%c0_63, %c0_64, %c0_65] : memref<1x1x128xf32, #tpu.memory_space<vmem>>, vector<1x1x128xf32>
    %209 = vector.shape_cast %208 : vector<1x1x128xf32> to vector<1x128xf32>
    %210 = vector.broadcast %209 : vector<1x128xf32> to vector<16x128xf32>
    %211 = arith.addf %207, %210 : vector<16x128xf32>
    %212 = arith.truncf %211 : vector<16x128xf32> to vector<16x128xbf16>
    %c0_66 = arith.constant 0 : index
    %c0_67 = arith.constant 0 : index
    %c0_68 = arith.constant 0 : index
    %213 = vector.load %arg12[%c0_66, %c0_67, %c0_68] : memref<1x128x512xbf16, #tpu.memory_space<vmem>>, vector<1x128x512xbf16>
    %214 = vector.shape_cast %213 : vector<1x128x512xbf16> to vector<128x512xbf16>
    %cst_69 = arith.constant dense<0.000000e+00> : vector<16x512xf32>
    %215 = tpu.matmul %212, %214, %cst_69 {dimension_numbers = #tpu.dot_dimension_numbers<[1], [0], [0], [1], [0, 0, 1, 1], [], []>} : vector<16x128xbf16>, vector<128x512xbf16>, vector<16x512xf32> -> vector<16x512xf32>
    %c0_70 = arith.constant 0 : index
    %c0_71 = arith.constant 0 : index
    %c0_72 = arith.constant 0 : index
    %216 = vector.load %arg13[%c0_70, %c0_71, %c0_72] : memref<1x1x512xf32, #tpu.memory_space<vmem>>, vector<1x1x512xf32>
    %217 = vector.shape_cast %216 : vector<1x1x512xf32> to vector<1x512xf32>
    %218 = vector.broadcast %217 : vector<1x512xf32> to vector<16x512xf32>
    %219 = arith.addf %215, %218 : vector<16x512xf32>
    %cst_73 = arith.constant 0.000000e+00 : f32
    %220 = vector.broadcast %cst_73 : f32 to vector<16x512xf32>
    %221 = arith.maximumf %219, %220 : vector<16x512xf32>
    %222 = arith.truncf %221 : vector<16x512xf32> to vector<16x512xbf16>
    %c0_74 = arith.constant 0 : index
    %c0_75 = arith.constant 0 : index
    %c0_76 = arith.constant 0 : index
    %223 = vector.load %arg14[%c0_74, %c0_75, %c0_76] : memref<1x512x128xbf16, #tpu.memory_space<vmem>>, vector<1x512x128xbf16>
    %224 = vector.shape_cast %223 : vector<1x512x128xbf16> to vector<512x128xbf16>
    %cst_77 = arith.constant dense<0.000000e+00> : vector<16x128xf32>
    %225 = tpu.matmul %222, %224, %cst_77 {dimension_numbers = #tpu.dot_dimension_numbers<[1], [0], [0], [1], [0, 0, 1, 1], [], []>} : vector<16x512xbf16>, vector<512x128xbf16>, vector<16x128xf32> -> vector<16x128xf32>
    %c0_78 = arith.constant 0 : index
    %c0_79 = arith.constant 0 : index
    %c0_80 = arith.constant 0 : index
    %226 = vector.load %arg15[%c0_78, %c0_79, %c0_80] : memref<1x1x128xf32, #tpu.memory_space<vmem>>, vector<1x1x128xf32>
    %227 = vector.shape_cast %226 : vector<1x1x128xf32> to vector<1x128xf32>
    %228 = vector.broadcast %227 : vector<1x128xf32> to vector<16x128xf32>
    %229 = arith.addf %225, %228 : vector<16x128xf32>
    %230 = arith.addf %211, %229 : vector<16x128xf32>
    %cst_81 = arith.constant dense<0.000000e+00> : vector<16xf32>
    %231 = vector.multi_reduction <add>, %230, %cst_81 [1] : vector<16x128xf32> to vector<16xf32>
    %232 = vector.shape_cast %231 : vector<16xf32> to vector<16x1xf32>
    %cst_82 = arith.constant 1.280000e+02 : f32
    %233 = vector.broadcast %cst_82 : f32 to vector<16x1xf32>
    %234 = arith.divf %232, %233 : vector<16x1xf32>
    %235 = vector.broadcast %234 : vector<16x1xf32> to vector<16x128xf32>
    %236 = arith.subf %230, %235 : vector<16x128xf32>
    %237 = arith.mulf %236, %236 : vector<16x128xf32>
    %cst_83 = arith.constant dense<0.000000e+00> : vector<16xf32>
    %238 = vector.multi_reduction <add>, %237, %cst_83 [1] : vector<16x128xf32> to vector<16xf32>
    %239 = vector.shape_cast %238 : vector<16xf32> to vector<16x1xf32>
    %cst_84 = arith.constant 1.280000e+02 : f32
    %240 = vector.broadcast %cst_84 : f32 to vector<16x1xf32>
    %241 = arith.divf %239, %240 : vector<16x1xf32>
    %242 = vector.broadcast %234 : vector<16x1xf32> to vector<16x128xf32>
    %243 = arith.subf %230, %242 : vector<16x128xf32>
    %cst_85 = arith.constant 9.99999974E-6 : f32
    %244 = vector.broadcast %cst_85 : f32 to vector<16x1xf32>
    %245 = arith.addf %241, %244 : vector<16x1xf32>
    %246 = math.rsqrt %245 : vector<16x1xf32>
    %247 = vector.broadcast %246 : vector<16x1xf32> to vector<16x128xf32>
    %248 = arith.mulf %243, %247 : vector<16x128xf32>
    %c0_86 = arith.constant 0 : index
    %c0_87 = arith.constant 0 : index
    %c0_88 = arith.constant 0 : index
    %249 = vector.load %arg16[%c0_86, %c0_87, %c0_88] : memref<1x1x128xf32, #tpu.memory_space<vmem>>, vector<1x1x128xf32>
    %250 = vector.shape_cast %249 : vector<1x1x128xf32> to vector<1x128xf32>
    %251 = vector.broadcast %250 : vector<1x128xf32> to vector<16x128xf32>
    %252 = arith.mulf %248, %251 : vector<16x128xf32>
    %c0_89 = arith.constant 0 : index
    %c0_90 = arith.constant 0 : index
    %c0_91 = arith.constant 0 : index
    %253 = vector.load %arg17[%c0_89, %c0_90, %c0_91] : memref<1x1x128xf32, #tpu.memory_space<vmem>>, vector<1x1x128xf32>
    %254 = vector.shape_cast %253 : vector<1x1x128xf32> to vector<1x128xf32>
    %255 = vector.broadcast %254 : vector<1x128xf32> to vector<16x128xf32>
    %256 = arith.addf %252, %255 : vector<16x128xf32>
    %c0_92 = arith.constant 0 : index
    %c0_93 = arith.constant 0 : index
    %257 = vector.load %arg23[%c0_92, %c0_93] : memref<16x128xf32, #tpu.memory_space<vmem>>, vector<16x128xf32>
    tpu.vector_store %arg23[%c0_92, %c0_93], %256 {strides = array<i32>} : memref<16x128xf32, #tpu.memory_space<vmem>>, vector<16x128xf32>,
    %c1_i32 = arith.constant 1 : i32
    %258 = arith.cmpi eq, %arg1, %c1_i32 : i32
    %259 = arith.extui %258 : i1 to i32
    %c0_i32_94 = arith.constant 0 : i32
    %260 = arith.cmpi ne, %259, %c0_i32_94 : i32
    scf.if %260 {
      %261 = vector.extract_strided_slice %256 {offsets = [0, 0], sizes = [8, 128], strides = [1, 1]} : vector<16x128xf32> to vector<8x128xf32>
      %cst_95 = arith.constant dense<0.000000e+00> : vector<128xf32>
      %262 = vector.multi_reduction <add>, %261, %cst_95 [0] : vector<8x128xf32> to vector<128xf32>
      %263 = vector.shape_cast %262 : vector<128xf32> to vector<1x128xf32>
      %cst_96 = arith.constant 8.000000e+00 : f32
      %264 = vector.broadcast %cst_96 : f32 to vector<1x128xf32>
      %265 = arith.divf %263, %264 : vector<1x128xf32>
      %266 = vector.extract_strided_slice %256 {offsets = [8, 0], sizes = [8, 128], strides = [1, 1]} : vector<16x128xf32> to vector<8x128xf32>
      %cst_97 = arith.constant dense<0.000000e+00> : vector<128xf32>
      %267 = vector.multi_reduction <add>, %266, %cst_97 [0] : vector<8x128xf32> to vector<128xf32>
      %268 = vector.shape_cast %267 : vector<128xf32> to vector<1x128xf32>
      %cst_98 = arith.constant 8.000000e+00 : f32
      %269 = vector.broadcast %cst_98 : f32 to vector<1x128xf32>
      %270 = arith.divf %268, %269 : vector<1x128xf32>
      %271 = tpu.concatenate %265, %270 in 0 : vector<1x128xf32>, vector<1x128xf32> -> vector<2x128xf32>
      %272 = arith.truncf %271 : vector<2x128xf32> to vector<2x128xbf16>
      %c0_99 = arith.constant 0 : index
      %c0_100 = arith.constant 0 : index
      %273 = vector.load %arg18[%c0_99, %c0_100] : memref<128x64xbf16, #tpu.memory_space<vmem>>, vector<128x64xbf16>
      %cst_101 = arith.constant dense<0.000000e+00> : vector<2x64xf32>
      %274 = tpu.matmul %272, %273, %cst_101 {dimension_numbers = #tpu.dot_dimension_numbers<[1], [0], [0], [1], [0, 0, 1, 1], [], []>} : vector<2x128xbf16>, vector<128x64xbf16>, vector<2x64xf32> -> vector<2x64xf32>
      %c0_102 = arith.constant 0 : index
      %c0_103 = arith.constant 0 : index
      %275 = vector.load %arg19[%c0_102, %c0_103] : memref<1x64xf32, #tpu.memory_space<vmem>>, vector<1x64xf32>
      %276 = vector.broadcast %275 : vector<1x64xf32> to vector<2x64xf32>
      %277 = arith.addf %274, %276 : vector<2x64xf32>
      %cst_104 = arith.constant 0.000000e+00 : f32
      %278 = vector.broadcast %cst_104 : f32 to vector<2x64xf32>
      %279 = arith.cmpf ogt, %277, %278 : vector<2x64xf32>
      %cst_105 = arith.constant 2.000000e-01 : f32
      %280 = vector.broadcast %cst_105 : f32 to vector<2x64xf32>
      %281 = arith.mulf %280, %277 : vector<2x64xf32>
      %282 = arith.select %279, %277, %281 : vector<2x64xi1>, vector<2x64xf32>
      %283 = arith.truncf %282 : vector<2x64xf32> to vector<2x64xbf16>
      %c0_106 = arith.constant 0 : index
      %c0_107 = arith.constant 0 : index
      %284 = vector.load %arg20[%c0_106, %c0_107] : memref<64x1xbf16, #tpu.memory_space<vmem>>, vector<64x1xbf16>
      %cst_108 = arith.constant dense<0.000000e+00> : vector<2x1xf32>
      %285 = tpu.matmul %283, %284, %cst_108 {dimension_numbers = #tpu.dot_dimension_numbers<[1], [0], [0], [1], [0, 0, 1, 1], [], []>} : vector<2x64xbf16>, vector<64x1xbf16>, vector<2x1xf32> -> vector<2x1xf32>
      %c0_109 = arith.constant 0 : index
      %c0_110 = arith.constant 0 : index
      %286 = vector.load %arg21[%c0_109, %c0_110] : memref<1x1xf32, #tpu.memory_space<vmem>>, vector<1x1xf32>
      %287 = vector.broadcast %286 : vector<1x1xf32> to vector<2x1xf32>
      %288 = arith.addf %285, %287 : vector<2x1xf32>
      %c0_111 = arith.constant 0 : index
      %c0_112 = arith.constant 0 : index
      %289 = vector.load %arg22[%c0_111, %c0_112] : memref<2x1xf32, #tpu.memory_space<vmem>>, vector<2x1xf32>
      tpu.vector_store %arg22[%c0_111, %c0_112], %288 {strides = array<i32>} : memref<2x1xf32, #tpu.memory_space<vmem>>, vector<2x1xf32>,
    } else {
    }
    return
  }
  func.func @transform_0(%arg0: i32, %arg1: i32) -> (i32, i32) {
    %c0_i32 = arith.constant 0 : i32
    %c0_i32_0 = arith.constant 0 : i32
    return %arg0, %c0_i32 : i32, i32
  }
  func.func @transform_1(%arg0: i32, %arg1: i32) -> (i32, i32) {
    %c0_i32 = arith.constant 0 : i32
    %c0_i32_0 = arith.constant 0 : i32
    %c0_i32_1 = arith.constant 0 : i32
    return %c0_i32, %c0_i32_0 : i32, i32
  }
  func.func @transform_2(%arg0: i32, %arg1: i32) -> (i32, i32) {
    %c0_i32 = arith.constant 0 : i32
    %c0_i32_0 = arith.constant 0 : i32
    %c0_i32_1 = arith.constant 0 : i32
    return %c0_i32, %c0_i32_0 : i32, i32
  }
  func.func @transform_3(%arg0: i32, %arg1: i32) -> (i32, i32) {
    %c0_i32 = arith.constant 0 : i32
    %c0_i32_0 = arith.constant 0 : i32
    %c0_i32_1 = arith.constant 0 : i32
    return %c0_i32, %c0_i32_0 : i32, i32
  }
  func.func @transform_4(%arg0: i32, %arg1: i32) -> (i32, i32, i32) {
    %c0_i32 = arith.constant 0 : i32
    %c0_i32_0 = arith.constant 0 : i32
    %c0_i32_1 = arith.constant 0 : i32
    return %arg1, %c0_i32, %c0_i32_0 : i32, i32, i32
  }
  func.func @transform_5(%arg0: i32, %arg1: i32) -> (i32, i32, i32) {
    %c0_i32 = arith.constant 0 : i32
    %c0_i32_0 = arith.constant 0 : i32
    %c0_i32_1 = arith.constant 0 : i32
    return %arg1, %c0_i32, %c0_i32_0 : i32, i32, i32
  }
  func.func @transform_6(%arg0: i32, %arg1: i32) -> (i32, i32, i32) {
    %c0_i32 = arith.constant 0 : i32
    %c0_i32_0 = arith.constant 0 : i32
    %c0_i32_1 = arith.constant 0 : i32
    return %arg1, %c0_i32, %c0_i32_0 : i32, i32, i32
  }
  func.func @transform_7(%arg0: i32, %arg1: i32) -> (i32, i32, i32) {
    %c0_i32 = arith.constant 0 : i32
    %c0_i32_0 = arith.constant 0 : i32
    %c0_i32_1 = arith.constant 0 : i32
    return %arg1, %c0_i32, %c0_i32_0 : i32, i32, i32
  }
  func.func @transform_8(%arg0: i32, %arg1: i32) -> (i32, i32, i32) {
    %c0_i32 = arith.constant 0 : i32
    %c0_i32_0 = arith.constant 0 : i32
    %c0_i32_1 = arith.constant 0 : i32
    return %arg1, %c0_i32, %c0_i32_0 : i32, i32, i32
  }
  func.func @transform_9(%arg0: i32, %arg1: i32) -> (i32, i32, i32) {
    %c0_i32 = arith.constant 0 : i32
    %c0_i32_0 = arith.constant 0 : i32
    %c0_i32_1 = arith.constant 0 : i32
    return %arg1, %c0_i32, %c0_i32_0 : i32, i32, i32
  }
  func.func @transform_10(%arg0: i32, %arg1: i32) -> (i32, i32, i32) {
    %c0_i32 = arith.constant 0 : i32
    %c0_i32_0 = arith.constant 0 : i32
    %c0_i32_1 = arith.constant 0 : i32
    return %arg1, %c0_i32, %c0_i32_0 : i32, i32, i32
  }
  func.func @transform_11(%arg0: i32, %arg1: i32) -> (i32, i32, i32) {
    %c0_i32 = arith.constant 0 : i32
    %c0_i32_0 = arith.constant 0 : i32
    %c0_i32_1 = arith.constant 0 : i32
    return %arg1, %c0_i32, %c0_i32_0 : i32, i32, i32
  }
  func.func @transform_12(%arg0: i32, %arg1: i32) -> (i32, i32, i32) {
    %c0_i32 = arith.constant 0 : i32
    %c0_i32_0 = arith.constant 0 : i32
    %c0_i32_1 = arith.constant 0 : i32
    return %arg1, %c0_i32, %c0_i32_0 : i32, i32, i32
  }
  func.func @transform_13(%arg0: i32, %arg1: i32) -> (i32, i32, i32) {
    %c0_i32 = arith.constant 0 : i32
    %c0_i32_0 = arith.constant 0 : i32
    %c0_i32_1 = arith.constant 0 : i32
    return %arg1, %c0_i32, %c0_i32_0 : i32, i32, i32
  }
  func.func @transform_14(%arg0: i32, %arg1: i32) -> (i32, i32, i32) {
    %c0_i32 = arith.constant 0 : i32
    %c0_i32_0 = arith.constant 0 : i32
    %c0_i32_1 = arith.constant 0 : i32
    return %arg1, %c0_i32, %c0_i32_0 : i32, i32, i32
  }
  func.func @transform_15(%arg0: i32, %arg1: i32) -> (i32, i32, i32) {
    %c0_i32 = arith.constant 0 : i32
    %c0_i32_0 = arith.constant 0 : i32
    %c0_i32_1 = arith.constant 0 : i32
    return %arg1, %c0_i32, %c0_i32_0 : i32, i32, i32
  }
  func.func @transform_16(%arg0: i32, %arg1: i32) -> (i32, i32) {
    %c0_i32 = arith.constant 0 : i32
    %c0_i32_0 = arith.constant 0 : i32
    %c0_i32_1 = arith.constant 0 : i32
    return %c0_i32, %c0_i32_0 : i32, i32
  }
  func.func @transform_17(%arg0: i32, %arg1: i32) -> (i32, i32) {
    %c0_i32 = arith.constant 0 : i32
    %c0_i32_0 = arith.constant 0 : i32
    %c0_i32_1 = arith.constant 0 : i32
    return %c0_i32, %c0_i32_0 : i32, i32
  }
  func.func @transform_18(%arg0: i32, %arg1: i32) -> (i32, i32) {
    %c0_i32 = arith.constant 0 : i32
    %c0_i32_0 = arith.constant 0 : i32
    %c0_i32_1 = arith.constant 0 : i32
    return %c0_i32, %c0_i32_0 : i32, i32
  }
  func.func @transform_19(%arg0: i32, %arg1: i32) -> (i32, i32) {
    %c0_i32 = arith.constant 0 : i32
    %c0_i32_0 = arith.constant 0 : i32
    %c0_i32_1 = arith.constant 0 : i32
    return %c0_i32, %c0_i32_0 : i32, i32
  }
  func.func @transform_20(%arg0: i32, %arg1: i32) -> (i32, i32) {
    %c0_i32 = arith.constant 0 : i32
    %c0_i32_0 = arith.constant 0 : i32
    return %arg0, %c0_i32 : i32, i32
  }
}

</mosaic_0001>

<bundles_post_ra>
// kernel: discriminator_forward.1
= control target key start
LH: loop header
LB: loop body
LE: loop exit
PB: predicated region body
PF: predicated region fallthrough
CT: control target
= control target key end

     0   :  { %s5119_s0 = inlined_call_operand.vmem [shape: f32[16,16], index: 0, kind: input, shape index: {}]   ;;  %s5120_s1 = inlined_call_operand.vmem [shape: bf16[16,128], index: 1, kind: input, shape index: {}]   ;;  %s5121_s2 = inlined_call_operand.vmem [shape: f32[1,128], index: 2, kind: input, shape index: {}]   ;;  %s5122_s3 = inlined_call_operand.vmem [shape: f32[16,128], index: 3, kind: input, shape index: {}]   ;;  %s5123_s4 = inlined_call_operand.hbm [shape: bf16[2,128,384], index: 4, kind: input, shape index: {}]   ;;  %s5124_s5 = inlined_call_operand.vmem [shape: f32[2,1,384], index: 5, kind: input, shape index: {}]   ;;  %s5125_s6 = inlined_call_operand.vmem [shape: bf16[2,128,128], index: 6, kind: input, shape index: {}]   ;;  %s5126_s7 = inlined_call_operand.vmem [shape: f32[2,1,128], index: 7, kind: input, shape index: {}]   ;;  %s5127_s8 = inlined_call_operand.vmem [shape: f32[2,1,128], index: 8, kind: input, shape index: {}]   ;;  %s5128_s9 = inlined_call_operand.vmem [shape: f32[2,1,128], index: 9, kind: input, shape index: {}]   ;;  %s5129_s10 = inlined_call_operand.hbm [shape: bf16[2,128,512], index: 10, kind: input, shape index: {}]   ;;  %s5130_s11 = inlined_call_operand.vmem [shape: f32[2,1,512], index: 11, kind: input, shape index: {}]   ;;  %s5131_s12 = inlined_call_operand.hbm [shape: bf16[2,512,128], index: 12, kind: input, shape index: {}]   ;;  %s5132_s13 = inlined_call_operand.vmem [shape: f32[2,1,128], index: 13, kind: input, shape index: {}]   ;;  %s5133_s14 = inlined_call_operand.vmem [shape: f32[2,1,128], index: 14, kind: input, shape index: {}]   ;;  %s5134_s15 = inlined_call_operand.vmem [shape: f32[2,1,128], index: 15, kind: input, shape index: {}]   ;;  %s5135_s16 = inlined_call_operand.vmem [shape: bf16[128,64], index: 16, kind: input, shape index: {}]   ;;  %s5136_s17 = inlined_call_operand.vmem [shape: f32[1,64], index: 17, kind: input, shape index: {}]   ;;  %s5137_s18 = inlined_call_operand.vmem [shape: bf16[64,1], index: 18, kind: input, shape index: {}]   ;;  %s5138_s19 = inlined_call_operand.<no memory space> [shape: f32[1,1], index: 19, kind: input, shape index: {}]   ;;  %s5139_s20 = inlined_call_operand.vmem [shape: f32[2,1], index: 20, kind: output, shape index: {}]  }
   0x1   :  { %5154 = sst [smem:[#allocation16_spill]] %s5119_s0  ;;  %v25_v0 = vstv %s5138_s19 }
   0x2   :  { %5155 = sst [smem:[#allocation17_spill]] %s5120_s1  ;;  %26 = vst [vmem:[#allocation3] sm:$0x1] %v25_v0 }
   0x3   :  { %5156 = sst [smem:[#allocation18_spill]] %s5121_s2 }
   0x4   :  { %5157 = sst [smem:[#allocation19_spill]] %s5122_s3 }
   0x5   :  { %5158 = sst [smem:[#allocation20_spill]] %s5123_s4 }
   0x6   :  { %5159 = sst [smem:[#allocation21_spill]] %s5124_s5 }
   0x7   :  { %5160 = sst [smem:[#allocation22_spill]] %s5125_s6 }
   0x8   :  { %5161 = sst [smem:[#allocation23_spill]] %s5129_s10 }
   0x9   :  { %5162 = sst [smem:[#allocation24_spill]] %s5131_s12 }
   0xa   :  { %5163 = sst [smem:[#allocation25_spill]] %s5133_s14 }
   0xb   :  { %5164 = sst [smem:[#allocation26_spill]] %s5134_s15 }
   0xc   :  { %5165 = sst [smem:[#allocation27_spill]] %s5135_s16 }
   0xd   :  { %5166 = sst [smem:[#allocation28_spill]] %s5136_s17 }
   0xe   :  { %5167 = sst [smem:[#allocation29_spill]] %s5137_s18 }
   0xf   :  { %5168 = sst [smem:[#allocation30_spill]] %s5139_s20 }
  0x10   :  { %27 = vsyncpa [#allocation5], 0 }
  0x11   :  { %29 = vsyncpa [#allocation5 + $0x1], 0 }
  0x12   :  { %30 = vsyncpa [#allocation7], 0 }
  0x13   :  { %32 = vsyncpa [#allocation7 + $0x1], 0  ;;  %s4450_s23 = smov 0   ;;  %s4452_s24 = smov 0  }
  0x14   :  { %s4454_s2 = smov 0   ;;  %s4456_s25 = smov 0  }
  0x15   :  { %s4458_s3 = smov 0   ;;  %s4460_s26 = smov 0  }
  0x16 LB: > { %5169 = sst [smem:[#allocation11_spill]] %s4305_s24  ;;  %s5143_s19 = sadd.s32 4294967295, %s4321_s26   ;;  %s4321_s26 = sphi %s4460_s26, %s38_s26   ;;  %s4317_s3 = sphi %s4458_s3, %s5208_s3   ;;  %s4313_s25 = sphi %s4456_s25, %s5207_s25   ;;  %s4309_s2 = sphi %s4454_s2, %s5206_s2   ;;  %s4305_s24 = sphi %s4452_s24, %s5205_s24   ;;  %s4301_s23 = sphi %s4450_s23, %s5204_s23  }
  0x17   : > { %5170 = sst [smem:[#allocation12_spill]] %s4309_s2  ;;  %s47_s27 = sadd.s32 1, %s4317_s3 }
  0x18   : > { %5171 = sst [smem:[#allocation13_spill]] %s4317_s3  ;;  %p48_p0 = scmp.ge.s32.totalorder %s47_s27, 2 }
  0x19   : > { %s146_s28 = sadd.s32 1, %s4309_s2  ;;  %p153_p1 = scmp.ne.s32.totalorder %s4309_s2, %s4305_s24 }
  0x1a   : > { %p154_p2 = scmp.eq.s32.totalorder %s4321_s26, 0  ;;  %s5210_s27 = smov (%p48_p0, %s47_s27), 0 }
  0x1b   : > { %5172 = sst [smem:[#allocation14_spill]] %s5210_s27  ;;  %p159_p4 = scmp.ne.s32.totalorder %s4305_s24, %s4301_s23 }
  0x1c   : > { %p155_p3 = por %p154_p2, %p153_p1  ;;  %s143_s4 = ssub.s32 %s4317_s3, %s5210_s27 }
  0x1d   : > { %p160_p5 = scmp.eq.s32.totalorder %s5143_s19, 0  ;;  %p144_p6 = scmp.eq.s32.totalorder %s143_s4, 0 }
  0x1e   : > { %p3922_p8 = scmp.lt.s32.totalorder %s4321_s26, 2  ;;  %s4500_s0 = sand.u32 1, %s4309_s2  }
  0x1f   : > { %p4491_p7 = por %p160_p5, %p159_p4  ;;  %s663_s1 = sand.u32 1, %s4321_s26  }
  0x20   : > { %s4497_s30 = scalar_select %p144_p6, %s4309_s2, %s146_s28  }
  0x21   : > { %s5173_s29 = scalar_select %p4491_p7, 1, 0 }
  0x22   : > { %5174 = sst [smem:[#allocation15_spill]] %s4497_s30  ;;  %p4502_p9 = pnand %p3922_p8, %p155_p3 }
  0x23   : > { %s5146_s22 = sshll.u32 %s4500_s0, 8  ;;  %s5147_s23 = sshll.u32 %s4317_s3, 12 }
  0x24   : > { %s5176_s10 = sld [smem:[#allocation23_spill]]  ;;  %s667_s28 = scalar_lea.vmem [#allocation6], %s5146_s22 }
  0x25   : > { %s674_s30 = sshll.u32 %s667_s28, 4  ;;  %s4520_s2 = scalar_lea.sflag [#allocation7], %s663_s1  ;;  %s4518_s30 = int_to_ptr.vmem [resolvable:$true] %s674_s30 }
  0x26   : > { %p4526_p11 = pneg %p4502_p9 }
  0x2a   : > { %s4514_s27 = scalar_lea.hbm %s5176_s10, %s5147_s23  ;;  %s4182_s22 = scalar_lea.hbm %s5176_s10, 8192 }
  0x2b   : > { %s4177_s20 = scalar_lea.hbm %s4514_s27, 4096  ;;  %p4183_p0 = scmp.lt.u32.totalorder %s4514_s27, %s5176_s10 }
  0x2c   : > { %p4178_p10 = scmp.ne.s32.totalorder %s4514_s27, %s4177_s20  ;;  %p4184_p1 = scmp.lt.u32.totalorder %s4182_s22, %s4177_s20 }
  0x2d   : > { %p4186_p3 = scmp.lt.u32.totalorder %s4177_s20, %s4514_s27 }
  0x2e   : > { %p4180_p12 = pnand %p4526_p11, %p4178_p10  ;;  %p4185_p2 = por %p4184_p1, %p4183_p0 }
  0x30   : > { %p4181_p13 = pneg %p4180_p12  ;;  %p4187_p4 = por %p4186_p3, %p4185_p2 }
  0x32   : > { %p4188_p5 = pnand %p4187_p4, %p4181_p13 }
  0x34   : > { %4191 = shalt.err (!%p4188_p5)
}
  0x35   : > { %s4192_s1 = scalar_lea.vmem %s4518_s30, 4096  ;;  %s4323_s19 = smov [#allocation6]  }
  0x36   : > { %p4193_p6 = scmp.ne.s32.totalorder %s4518_s30, %s4192_s1  ;;  %s4197_s4 = sshll.u32 %s4323_s19, 4  ;;  %s4198_s4 = int_to_ptr.vmem [resolvable:$false] %s4197_s4 }
  0x37   : > { %s4199_s23 = scalar_lea.vmem %s4198_s4, 8192  ;;  %p4200_p12 = scmp.lt.s32.totalorder %s4518_s30, %s4198_s4 }
  0x38   : > { %p4195_p8 = pnand %p4193_p6, %p4526_p11  ;;  %p4201_p7 = scmp.lt.s32.totalorder %s4199_s23, %s4192_s1 }
  0x3a   : > { %p4196_p10 = pneg %p4195_p8  ;;  %p4202_p0 = por %p4201_p7, %p4200_p12 }
  0x3c   : > { %p4203_p1 = pnand %p4202_p0, %p4196_p10 }
  0x3e   : > { %4206 = shalt.err (!%p4203_p1)
}
  0x3f   : > { %s4324_s20 = smov 256   ;;  %s4325_s22 = smov 16  }
  0x40   : > { %3918 = dma.hbm_to_vmem [thread:$0]  (!%p4502_p9), %s4514_s27, 4096, %s4518_s30, %s4520_s2, %s4324_s20, %s4324_s20, %s4325_s22  }
  0x41   : > { %s5178_s28 = sshll.u32 %s4317_s3, 12  ;;  %s5179_s12 = sld [smem:[#allocation24_spill]] }
  0x42   : > { %s5180_s23 = sshll.u32 %s4500_s0, 8  ;;  %p3468_p7 = scmp.ge.s32.totalorder %s4321_s26, 1 }
  0x43   : > { %s695_s10 = scalar_lea.vmem [#allocation8], %s5180_s23  ;;  %p728_p13 = scmp.lt.s32.totalorder %s4321_s26, 3 }
  0x44   : > { %s702_s18 = sshll.u32 %s695_s10, 4  ;;  %s3902_s15 = smul.u32 192, %s4500_s0  ;;  %s4559_s18 = int_to_ptr.vmem [resolvable:$true] %s702_s18 }
  0x45   : > { %p4563_p2 = pnand %p3468_p7, %p728_p13  ;;  %s3903_s27 = smul.u32 3072, %s4317_s3 }
  0x46   : > { %s5182_s22 = sld [smem:[#allocation20_spill]]  ;;  %s613_s10 = scalar_lea.vmem [#allocation4], %s3902_s15 }
  0x47   : > { %s4555_s4 = scalar_lea.hbm %s5179_s12, %s5178_s28  ;;  %s620_s28 = sshll.u32 %s613_s10, 4  ;;  %s4574_s28 = int_to_ptr.vmem [resolvable:$true] %s620_s28 }
  0x48   : > { %s5181_s16 = scalar_select %p4563_p2, 1, 0 }
  0x49   : > { %s610_s19 = scalar_lea.sflag [#allocation5], %s4500_s0 }
  0x4c   : > { %s4572_s1 = scalar_lea.hbm %s5182_s22, %s3903_s27  ;;  %s4212_s30 = scalar_lea.hbm %s5182_s22, 6144 }
  0x4d   : > { %s4207_s23 = scalar_lea.hbm %s4572_s1, 3072  ;;  %p4213_p6 = scmp.lt.u32.totalorder %s4572_s1, %s5182_s22 }
  0x4e   : > { %p4208_p3 = scmp.ne.s32.totalorder %s4572_s1, %s4207_s23  ;;  %p4214_p8 = scmp.lt.u32.totalorder %s4212_s30, %s4207_s23 }
  0x4f   : > { %p4216_p12 = scmp.lt.u32.totalorder %s4207_s23, %s4572_s1 }
  0x50   : > { %p4210_p4 = pnand %p4208_p3, %p4526_p11  ;;  %p4215_p10 = por %p4214_p8, %p4213_p6 }
  0x52   : > { %p4211_p5 = pneg %p4210_p4  ;;  %p4217_p0 = por %p4216_p12, %p4215_p10 }
  0x54   : > { %p4218_p1 = pnand %p4217_p0, %p4211_p5 }
  0x56   : > { %4221 = shalt.err (!%p4218_p1)
}
  0x57   : > { %s4222_s15 = scalar_lea.vmem %s4574_s28, 3072  ;;  %s4326_s14 = smov [#allocation4]  }
  0x58   : > { %p4223_p7 = scmp.ne.s32.totalorder %s4574_s28, %s4222_s15  ;;  %s4227_s3 = sshll.u32 %s4326_s14, 4  ;;  %s4228_s3 = int_to_ptr.vmem [resolvable:$false] %s4227_s3 }
  0x59   : > { %s4229_s10 = scalar_lea.vmem %s4228_s3, 6144  ;;  %p4230_p4 = scmp.lt.s32.totalorder %s4574_s28, %s4228_s3 }
  0x5a   : > { %p4225_p13 = pnand %p4223_p7, %p4526_p11  ;;  %p4231_p2 = scmp.lt.s32.totalorder %s4229_s10, %s4222_s15 }
  0x5c   : > { %p4226_p3 = pneg %p4225_p13  ;;  %p4232_p6 = por %p4231_p2, %p4230_p4 }
  0x5e   : > { %p4233_p8 = pnand %p4232_p6, %p4226_p3 }
  0x60   : > { %4236 = shalt.err (!%p4233_p8)
}
  0x61   : > { %s4327_s23 = smov 192   ;;  %s4328_s30 = smov 12  }
  0x62   : > { %3915 = dma.hbm_to_vmem [thread:$0]  (!%p4502_p9), %s4572_s1, 3072, %s4574_s28, %s610_s19, %s4327_s23, %s4327_s23, %s4328_s30  }
  0x63   : > { %s4237_s27 = scalar_lea.hbm %s4555_s4, 4096  ;;  %s4242_s14 = scalar_lea.hbm %s5179_s12, 8192 }
  0x64   : > { %p4238_p5 = scmp.ne.s32.totalorder %s4555_s4, %s4237_s27  ;;  %p4243_p12 = scmp.lt.u32.totalorder %s4555_s4, %s5179_s12 }
  0x65   : > { %p4244_p0 = scmp.lt.u32.totalorder %s4242_s14, %s4237_s27  ;;  %p4246_p7 = scmp.lt.u32.totalorder %s4237_s27, %s4555_s4 }
  0x66   : > { %p4240_p2 = pnand %p4238_p5, %p4526_p11 }
  0x67   : > { %p4245_p1 = por %p4244_p0, %p4243_p12 }
  0x68   : > { %p4241_p10 = pneg %p4240_p2 }
  0x69   : > { %p4247_p13 = por %p4246_p7, %p4245_p1 }
  0x6b   : > { %p4248_p3 = pnand %p4247_p13, %p4241_p10 }
  0x6d   : > { %4251 = shalt.err (!%p4248_p3)
}
  0x6e   : > { %s4252_s0 = scalar_lea.vmem %s4559_s18, 4096  ;;  %s4329_s1 = smov [#allocation8]  }
  0x6f   : > { %p4253_p4 = scmp.ne.s32.totalorder %s4559_s18, %s4252_s0  ;;  %s4257_s28 = sshll.u32 %s4329_s1, 4  ;;  %s4258_s28 = int_to_ptr.vmem [resolvable:$false] %s4257_s28 }
  0x70   : > { %s4259_s19 = scalar_lea.vmem %s4258_s28, 8192  ;;  %p4260_p5 = scmp.lt.s32.totalorder %s4559_s18, %s4258_s28 }
  0x71   : > { %p4255_p6 = pnand %p4253_p4, %p4526_p11  ;;  %p4261_p2 = scmp.lt.s32.totalorder %s4259_s19, %s4252_s0 }
  0x73   : > { %p4256_p8 = pneg %p4255_p6  ;;  %p4262_p12 = por %p4261_p2, %p4260_p5 }
  0x75   : > { %p4263_p0 = pnand %p4262_p12, %p4256_p8 }
  0x77   : > { %4266 = shalt.err (!%p4263_p0)
}
  0x78   : > { %s4330_s23 = smov 64   ;;  %s4331_s30 = smov 4  }
  0x79   : > { %3921 = dma.hbm_to_vmem [thread:$0]  (!%p4502_p9), %s4555_s4, 4096, %s4559_s18, %s4520_s2, %s4330_s23, %s4330_s23, %s4331_s30  }
  0x7a   : > { %p5183_p11 = scmp.ne.s32.totalorder %s5181_s16, 0 }
  0x7b   : > { %s734_s17 = sand.u32 (!%p5183_p11), 1, %s4305_s24   ;;  %p5184_p10 = scmp.ne.s32.totalorder (!%p5183_p11), %s5173_s29, 0 }
  0x7c   : > { %732 = sbr.rel (%p5183_p11) target bundleno = 3846 (0xf06), region = 100  ;;  %s735_s20 = scalar_lea.sflag (!%p5183_p11), [#allocation5], %s734_s17 }
  0x7d   : > { %s3904_s27 = smul.u32 (!%p5183_p11), 192, %s734_s17 }
  0x7f   : > { %s4625_s15 = scalar_lea.vmem (!%p5183_p11), [#allocation4], %s3904_s27 }
  0x83   : > { %4292 = dma.done.wait (%p5184_p10), %s735_s20, 3072  }
  0x84   : > { %4294 = vsyncadd (%p5184_p10), %s735_s20, 4294964224  ;;  %s5185_s14 = sadd.s32 4294967295, %s4321_s26   ;;  %s3469_s18 = sshll.u32 %s734_s17, 8 }
  0x85   : > { %s743_s21 = sand.u32 1, %s5185_s14   ;;  %s4633_s16 = scalar_lea.vmem [#allocation6], %s3469_s18 }
  0x86   : > { %s744_s2 = scalar_lea.sflag [#allocation7], %s743_s21 }
  0x87   : > { %4296 = dma.done.wait (%p5184_p10), %s744_s2, 8192  }
  0x88   : > { %4298 = vsyncadd (%p5184_p10), %s744_s2, 4294959104  ;;  %p864_p9 = scmp.lt.s32.totalorder %s4313_s25, 1  ;;  %s5186_s6 = sld [smem:[#allocation22_spill]] }
  0x89   : > { %s5187_s5 = sld [smem:[#allocation21_spill]]  ;;  %s5188_s23 = sld [smem:[#allocation25_spill]] }
  0x8a   : > { %s4641_s4 = scalar_select %p864_p9, %s4313_s25, 1 }
  0x8b   : > { %s5189_s21 = sld [smem:[#allocation26_spill]]  ;;  %s4685_s12 = scalar_lea.vmem [#allocation8], %s3469_s18 }
  0x8c   : > { %s3905_s3 = smul.u32 3, %s4641_s4  ;;  %s3617_s10 = sshll.u32 %s4641_s4, 6 }
  0x8d   : > { %s881_s22 = scalar_lea.vmem %s5128_s9, %s4641_s4  ;;  %s3473_s0 = sshll.u32 %s4641_s4, 2 }
  0x8e   : > { %s4648_s29 = scalar_lea.vmem %s5186_s6, %s3617_s10  ;;  %s4671_s6 = scalar_lea.vmem %s5130_s11, %s3473_s0 }
  0x8f   : > { %s4657_s27 = scalar_lea.vmem %s5187_s5, %s3905_s3  ;;  %s888_s30 = scalar_lea.vmem %s5132_s13, %s4641_s4 }
  0x90   : > { %s891_s5 = scalar_lea.vmem %s5188_s23, %s4641_s4  ;;  %p3474_p1 = scmp.ne.s32.totalorder %s4313_s25, 0 }
  0x91   : > { %s894_s24 = scalar_lea.vmem %s5189_s21, %s4641_s4  ;;  %s5190_s10 = sld [smem:[#allocation17_spill]] (!%p3474_p1)  ;;  %v4332_v2 = vmov (!%p3474_p1), 0.0   ;;  %vm4333_vm0 = vmmov (!%p3474_p1), 0   ;;  %vm922_vm1 = vcmask (!%p3474_p1), 130048  }
  0x92   : > { %903 = sbr.rel (%p3474_p1) target bundleno = 374 (0x176), region = 116  ;;  %3728 = vmatprep.subr.bf16.mxu0 (!%p3474_p1), %v4332_v2  ;;  %s5191_s19 = sld [smem:[#allocation16_spill]] (!%p3474_p1)  ;;  %3730 = vmatprep.mubr.msk.bf16.mxu0 (!%p3474_p1), %vm4333_vm0, %v4332_v2 }
  0x93   : > { %s5192_s17 = sld [smem:[#allocation18_spill]] (!%p3474_p1)  ;;  %s5193_s2 = sld [smem:[#allocation19_spill]] (!%p3474_p1) }
  0x97   : > { %v3987_v1 = vld [vmem:[%s5190_s10] sm:$0xff] (!%p3474_p1)  }
  0x98   : > { %v904_v3 = vld [vmem:[%s5191_s19] sm:$0xff] (!%p3474_p1)  ;;  %v905_v4 = vld [vmem:[%s5191_s19 + $0x8] sm:$0xff] (!%p3474_p1)  ;;  %3729 = vmatpush3.bf16.msra.mxu0 (!%p3474_p1), %v3987_v1 }
  0x99   : > { %v906_v5 = vpack.c.bf16 %v905_v4, %v904_v3  ;;  %v3475_v6 = vld [vmem:[%s5192_s17] ss:$0 sm:$0xff]  ;;  %s5194_s0 = smov %s5193_s2 }
  0x9a   : > { %v967_v8 = vld [vmem:[%s5193_s2] sm:$0xff]  ;;  %v968_v12 = vld [vmem:[%s5194_s0 + $0x8] sm:$0xff] }
  0x9b   : > { %3731 = vmatmul.mubr.msk.bf16.vlgmr.msra.gmra.mrb[0].mxu0 %vm922_vm1, %v906_v5 }
 0x16e   : > { %v960_v7 = vpop.f32.mrb[0].mxu0 }
 0x16f   : > { %v961_v9 = vadd.f32 %v3475_v6, %v960_v7  ;;  %v3732_v10 = vpop.f32.mrb[1].mxu0 }
 0x170   : > { %v963_v11 = vpop.f32.mrb[2].mxu0 }
 0x171   : > { %v969_v13 = vadd.f32 %v967_v8, %v961_v9  ;;  %v964_v14 = vadd.f32 %v3475_v6, %v963_v11  ;;  %v3733_v15 = vpop.f32.mrb[3].mxu0 }
 0x173   : > { %971 = vst [vmem:[#allocation2] sm:$0xff] %v969_v13  ;;  %v970_v16 = vadd.f32 %v968_v12, %v964_v14 }
 0x175   : > { %972 = vst [vmem:[#allocation2 + $0x8] sm:$0xff] %v970_v16 }
 0x176 PF: > { %v4003_v17 = vld [vmem:[%s4625_s15 + $0x4] ss:$12 sps:$4 sm:$0xff]   ;;  %v4005_v18 = vld [vmem:[%s4625_s15] ss:$12 sps:$4 sm:$0xff]   ;;  %v4334_v19 = vmov 0   ;;  %v4335_v20 = vmov 0.0   ;;  %v1010_v46 = vlaneseq  ;;  %s5195_s3 = scalar_lea.vmem %s5126_s7, %s4641_s4  ;;  %s5196_s21 = scalar_lea.vmem %s5127_s8, %s4641_s4 }
 0x177   : > { %1185 = vmatprep.mubr.bf16.mxu0 %v4334_v19  ;;  %3734 = vmatprep.subr.bf16.mxu1 %v4335_v20  ;;  %v4006_v21 = vld [vmem:[%s4625_s15 + $0x1c] ss:$12 sps:$4 sm:$0xff]   ;;  %v4008_v22 = vld [vmem:[%s4625_s15 + $0x18] ss:$12 sps:$4 sm:$0xff]   ;;  %v4009_v23 = vld [vmem:[%s4625_s15 + $0x34] ss:$12 sps:$4 sm:$0xff]  }
 0x178   : > { %1153 = vmatprep.subr.bf16.mxu0 %v4003_v17  ;;  %v4011_v24 = vld [vmem:[%s4625_s15 + $0x30] ss:$12 sps:$4 sm:$0xff]   ;;  %v4012_v25 = vld [vmem:[%s4625_s15 + $0x4c] ss:$12 sps:$4 sm:$0xff]   ;;  %v4014_v26 = vld [vmem:[%s4625_s15 + $0x48] ss:$12 sps:$4 sm:$0xff]  }
 0x179   : > { %1154 = vmatpush1.bf16.msra.mxu0 %v4005_v18  ;;  %v4015_v27 = vld [vmem:[%s4625_s15 + $0x64] ss:$12 sps:$4 sm:$0xff]   ;;  %v4027_v28 = vld [vmem:[%s4625_s15 + $0x8] ss:$12 sps:$4 sm:$0xff]   ;;  %v4028_v29 = vld [vmem:[%s4625_s15 + $0x20] ss:$12 sps:$4 sm:$0xff]  }
 0x17a   : > { %1155 = vmatprep.subr.bf16.mxu0 %v4006_v21  ;;  %3735 = vmatpush3.bf16.msra.mxu1 %v4027_v28  ;;  %v4017_v30 = vld [vmem:[%s4625_s15 + $0x60] ss:$12 sps:$4 sm:$0xff]   ;;  %v4018_v31 = vld [vmem:[%s4625_s15 + $0x7c] ss:$12 sps:$4 sm:$0xff]   ;;  %v4029_v32 = vld [vmem:[%s4625_s15 + $0x38] ss:$12 sps:$4 sm:$0xff]  }
 0x17b   : > { %3736 = vmatprep.subr.bf16.mxu1 %v4335_v20  ;;  %v4020_v33 = vld [vmem:[%s4625_s15 + $0x78] ss:$12 sps:$4 sm:$0xff]   ;;  %v4021_v34 = vld [vmem:[%s4625_s15 + $0x94] ss:$12 sps:$4 sm:$0xff]   ;;  %v4030_v35 = vld [vmem:[%s4625_s15 + $0x50] ss:$12 sps:$4 sm:$0xff]  }
 0x17c   : > { %v4023_v36 = vld [vmem:[%s4625_s15 + $0x90] ss:$12 sps:$4 sm:$0xff]   ;;  %v4024_v37 = vld [vmem:[%s4625_s15 + $0xac] ss:$12 sps:$4 sm:$0xff]   ;;  %v4031_v38 = vld [vmem:[%s4625_s15 + $0x68] ss:$12 sps:$4 sm:$0xff]  }
 0x17d   : > { %1156 = vmatpush1.bf16.msra.mxu0 %v4008_v22  ;;  %v4026_v39 = vld [vmem:[%s4625_s15 + $0xa8] ss:$12 sps:$4 sm:$0xff]   ;;  %v4032_v42 = vld [vmem:[%s4625_s15 + $0x80] ss:$12 sps:$4 sm:$0xff]   ;;  %v4033_v44 = vld [vmem:[%s4625_s15 + $0x98] ss:$12 sps:$4 sm:$0xff]  }
 0x17e   : > { %1157 = vmatprep.subr.bf16.mxu0 %v4009_v23  ;;  %3737 = vmatpush3.bf16.msra.mxu1 %v4028_v29  ;;  %v973_v40 = vld [vmem:[#allocation2] sm:$0xff]  ;;  %v974_v41 = vld [vmem:[#allocation2 + $0x8] sm:$0xff]  ;;  %vm4336_vm2 = vmmov 0   ;;  %v4747_v47 = vshrl.u32 %v1010_v46, 7  ;;  %vm1240_vm3 = vcmask 261120   ;;  %s4339_s28 = smov 32  }
 0x17f   : > { %3738 = vmatprep.subr.bf16.mxu1 %v4335_v20  ;;  %v975_v43 = vpack.c.bf16 %v974_v41, %v973_v40  ;;  %v4034_v45 = vld [vmem:[%s4625_s15 + $0xb0] ss:$12 sps:$4 sm:$0xff]   ;;  %3750 = vmatprep.mubr.msk.bf16.mxu1 %vm4336_vm2, %v4335_v20  ;;  %s4337_s15 = smov 96   ;;  %vm1304_vm4 = vcmask 1043456   ;;  %vm1288_vm5 = vcmask 64512   ;;  %vm1697_vm6 = vcmask 523264  }
 0x180   : > { %v1016_v48 = vsub.s32 1, %v4747_v47  ;;  %v1008_v49 = vld [vmem:[%s4657_s27] sm:$0x7]  ;;  %v1012_v50 = vsub.s32 0, %v4747_v47  ;;  %s4338_s27 = smov 64   ;;  %v1020_v2 = vsub.s32 2, %v4747_v47 }
 0x181   : > { %1158 = vmatpush1.bf16.msra.mxu0 %v4011_v24  ;;  %vm1699_vm7 = vcmask 785408   ;;  %p3596_p7 = scmp.ne.s32.totalorder %s4313_s25, 1 }
 0x182   : > { %1159 = vmatprep.subr.bf16.mxu0 %v4012_v25  ;;  %3739 = vmatpush3.bf16.msra.mxu1 %v4029_v32  ;;  %v1017_v51 = vrot.slane %v1008_v49, %v1016_v48  ;;  %v1013_v52 = vrot.slane %v1008_v49, %v1012_v50  ;;  %v1021_v3 = vrot.slane %v1008_v49, %v1020_v2  ;;  %vm4341_vm8 = vmmov (!%p3596_p7), 0   ;;  %s5203_s18 = sld [smem:[#allocation30_spill]] (!%p3596_p7) }
 0x183   : > { %3740 = vmatprep.subr.bf16.mxu1 %v4335_v20  ;;  %vm3037_vm9 = vcmask (!%p3596_p7), 1040384   ;;  %vm3237_vm11 = vcmask (!%p3596_p7), 1024  }
 0x185   : > { %1160 = vmatpush1.bf16.msra.mxu0 %v4014_v26 }
 0x186   : > { %1161 = vmatprep.subr.bf16.mxu0 %v4015_v27  ;;  %3741 = vmatpush3.bf16.msra.mxu1 %v4030_v35 }
 0x187   : > { %3742 = vmatprep.subr.bf16.mxu1 %v4335_v20 }
 0x189   : > { %1162 = vmatpush1.bf16.msra.mxu0 %v4017_v30 }
 0x18a   : > { %1163 = vmatprep.subr.bf16.mxu0 %v4018_v31  ;;  %3743 = vmatpush3.bf16.msra.mxu1 %v4031_v38 }
 0x18b   : > { %3744 = vmatprep.subr.bf16.mxu1 %v4335_v20 }
 0x18d   : > { %1164 = vmatpush1.bf16.msra.mxu0 %v4020_v33 }
 0x18e   : > { %1165 = vmatprep.subr.bf16.mxu0 %v4021_v34  ;;  %3745 = vmatpush3.bf16.msra.mxu1 %v4032_v42 }
 0x18f   : > { %3746 = vmatprep.subr.bf16.mxu1 %v4335_v20 }
 0x191   : > { %1166 = vmatpush1.bf16.msra.mxu0 %v4023_v36 }
 0x192   : > { %1167 = vmatprep.subr.bf16.mxu0 %v4024_v37  ;;  %3747 = vmatpush3.bf16.msra.mxu1 %v4033_v44 }
 0x193   : > { %3748 = vmatprep.subr.bf16.mxu1 %v4335_v20 }
 0x195   : > { %1168 = vmatpush1.bf16.msra.mxu0 %v4026_v39 }
 0x196   : > { %3778 = vmatprep.subr.bf16.mxu0 %v4335_v20  ;;  %3749 = vmatpush3.bf16.msra.mxu1 %v4034_v45 }
 0x197   : > { %3754 = vmatprep.subr.bf16.mxu1 %v4335_v20 }
 0x198   : > { %1186 = vmatmul.mubr.bf16.vlgmr.msra.gmra.mrb[0].mxu0 %v975_v43 }
 0x199   : > { %3780 = vmatprep.mubr.msk.bf16.mxu0 %vm4336_vm2, %v4335_v20  ;;  %3751 = vmatmul.mubr.bf16.vlgmr.msra.gmra.mrb[0].mxu1 %v975_v43 }
 0x19a   : > { %3756 = vmatprep.mubr.msk.bf16.mxu1 %vm4336_vm2, %v4335_v20 }
 0x26b   : > { %v1187_v53 = vpop.f32.mrb[0].mxu0 }
 0x26c   : > { %v1189_v54 = vpop.f32.mrb[1].mxu0  ;;  %v1188_v58 = vadd.f32 %v1187_v53, %v1013_v52  ;;  %v1230_v4 = vpop.f32.mrb[0].mxu1 }
 0x26d   : > { %v1190_v55 = vadd.f32 %v1189_v54, %v1017_v51  ;;  %v1191_v56 = vpop.f32.mrb[2].mxu0  ;;  %v1231_v5 = vadd.f32 %v1230_v4, %v1021_v3  ;;  %v3752_v6 = vpop.f32.mrb[1].mxu1 }
 0x26e   : > { %v1193_v57 = vpop.f32.mrb[3].mxu0  ;;  %v1237_v61 = vpack.c.bf16 %v1188_v58, %v1188_v58  ;;  %v1192_v63 = vadd.f32 %v1191_v56, %v1013_v52  ;;  %v1233_v7 = vpop.f32.mrb[2].mxu1 }
 0x26f   : > { %v1238_v59 = vpack.c.bf16 %v1190_v55, %v1190_v55  ;;  %v1194_v62 = vadd.f32 %v1193_v57, %v1017_v51  ;;  %v4776_v8 = vpack.c.bf16 %v1231_v5, %v1231_v5  ;;  %v4778_v9 = vadd.f32 %v1233_v7, %v1021_v3  ;;  %v3753_v10 = vpop.f32.mrb[3].mxu1 }
 0x270   : > { %v4767_v1 = vpack.c.bf16 %v1192_v63, %v1192_v63 }
 0x271   : > { %1352 = vrot.lane.b32.xlu1 %v1238_v59, %s4337_s15  ;;  %v1245_v60 = vsel %vm1240_vm3, %v1238_v59, 0  ;;  %v1702_v0 = vpack.c.bf16 %v1194_v62, %v1194_v62  ;;  %v1306_v11 = vsel %vm1304_vm4, %v4776_v8, 0 }
 0x272   : > { %3755 = vmatpush3.bf16.xpose.msra.mxu1 %v1245_v60 }
 0x273   : > { %3760 = vmatprep.subr.bf16.mxu1 %v4335_v20  ;;  %v1708_v38 = vsel %vm1240_vm3, %v1702_v0, 0 }
 0x275   : > { %1349 = vrot.lane.b32.xlu1 %v1237_v61, %s4337_s15 }
 0x279   : > { %1462 = vrot.lane.b32.xlu1 %v1237_v61, %s4338_s27  ;;  %3757 = vmatmul.mubr.msk.bf16.vlgmr.msra.gmra.mrb[4].mxu1 %vm1240_vm3, %v1237_v61 }
 0x27a   : > { %3762 = vmatprep.mubr.msk.bf16.mxu1 %vm4336_vm2, %v4335_v20  ;;  %3761 = vmatpush3.bf16.msra.mxu1 %v1306_v11 }
 0x27b   : > { %3766 = vmatprep.subr.bf16.mxu1 %v4335_v20 }
 0x27d   : > { %1575 = vrot.lane.b32.xlu1 %v1238_v59, %s4339_s28 }
 0x281   : > { %1573 = vrot.lane.b32.xlu1 %v1237_v61, %s4339_s28 }
 0x285   : > { %1813 = vrot.lane.b32.xlu1 %v1702_v0, %s4337_s15 }
 0x289   : > { %1810 = vrot.lane.b32.xlu1 %v4767_v1, %s4337_s15 }
 0x28d   : > { %1925 = vrot.lane.b32.xlu1 %v1702_v0, %s4338_s27 }
 0x291   : > { %2036 = vrot.lane.b32.xlu1 %v1702_v0, %s4339_s28 }
 0x2e3   : > { %v1353_v25 = vpop.permute.xlu1 %1352 }
 0x2e4   : > { %v1358_v36 = vsel %vm1240_vm3, %v1353_v25, 0 }
 0x2e7   : > { %v1350_v26 = vpop.permute.xlu1 %1349 }
 0x2eb   : > { %v1463_v28 = vpop.permute.xlu1 %1462 }
 0x2ef   : > { %v1576_v31 = vpop.permute.xlu1 %1575 }
 0x2f0   : > { %v1581_v34 = vsel %vm1240_vm3, %v1576_v31, 0 }
 0x2f3   : > { %v1574_v37 = vpop.permute.xlu1 %1573 }
 0x2f7   : > { %v1814_v39 = vpop.permute.xlu1 %1813 }
 0x2f8   : > { %v1819_v41 = vsel %vm1240_vm3, %v1814_v39, 0 }
 0x2fb   : > { %v1811_v40 = vpop.permute.xlu1 %1810 }
 0x2ff   : > { %v1926_v42 = vpop.permute.xlu1 %1925 }
 0x300   : > { %v1931_v43 = vsel %vm1240_vm3, %v1926_v42, 0 }
 0x303   : > { %v2037_v44 = vpop.permute.xlu1 %2036 }
 0x304   : > { %v2042_v46 = vsel %vm1240_vm3, %v2037_v44, 0 }
 0x34c   : > { %v1281_v12 = vpop.f32.mrb[4].mxu1 }
 0x34d   : > { %v1287_v13 = vmul.f32 0.17677669, %v1281_v12  ;;  %v3758_v14 = vpop.f32.mrb[5].mxu1 }
 0x34e   : > { %v1284_v15 = vpop.f32.mrb[6].mxu1 }
 0x34f   : > { %v3759_v16 = vpop.f32.mrb[7].mxu1  ;;  %v1289_v17 = vsel %vm1288_vm5, %v1287_v13, -inf }
 0x350   : > { %1290 = vmax.xlane.f32.xlu0 %v1289_v17 }
 0x3dd   : > { %v1291_v18 = vpop.xlane.xlu0 %1290 }
 0x3de   : > { %v1292_v21 = vsub.f32 %v1287_v13, %v1291_v18 }
 0x3e0   : > { %v1293_v22 = vmul.f32 1.442695, %v1292_v21 }
 0x3e2   : > { %4123 = vpow2.f32 %v1293_v22 }
 0x3ec   : > { %v4124_v23 = vpop.eup %4123 }
 0x3ed   : > { %v1295_v24 = vsel %vm1288_vm5, %v4124_v23, 0.0 }
 0x3ee   : > { %1296 = vadd.xlane.f32.xlu0 %v1295_v24 }
 0x404   : > { %1464 = vrot.lane.b32.xlu0 %v1238_v59, %s4338_s27 }
 0x408   : > { %1923 = vrot.lane.b32.xlu0 %v4767_v1, %s4338_s27 }
 0x40c   : > { %2034 = vrot.lane.b32.xlu0 %v4767_v1, %s4339_s28 }
 0x47b   : > { %v1297_v27 = vpop.xlane.xlu0 %1296 }
 0x47c   : > { %4125 = vrcp.f32 %v1297_v27 }
 0x47f   : > { %v1465_v29 = vpop.permute.xlu0 %1464 }
 0x480   : > { %v1470_v30 = vsel %vm1240_vm3, %v1465_v29, 0 }
 0x481   : > { %3779 = vmatpush3.bf16.xpose.msra.mxu0 %v1470_v30 }
 0x482   : > { %3790 = vmatprep.subr.bf16.mxu0 %v4335_v20 }
 0x483   : > { %v1924_v45 = vpop.permute.xlu0 %1923 }
 0x486   : > { %v4126_v32 = vpop.eup %4125 }
 0x487   : > { %v1299_v33 = vmul.f32 %v4126_v32, %v4124_v23  ;;  %v2035_v49 = vpop.permute.xlu0 %2034 }
 0x488   : > { %3781 = vmatmul.mubr.msk.bf16.vlgmr.msra.gmra.mrb[4].mxu0 %vm1240_vm3, %v1463_v28 }
 0x489   : > { %3791 = vmatpush3.bf16.xpose.msra.mxu0 %v1581_v34  ;;  %v1300_v35 = vpack.c.bf16 %v1299_v33, %v1299_v33  ;;  %3792 = vmatprep.mubr.msk.bf16.mxu0 %vm4336_vm2, %v4335_v20 }
 0x48a   : > { %3802 = vmatprep.subr.bf16.mxu0 %v4335_v20 }
 0x48b   : > { %3763 = vmatmul.mubr.msk.bf16.vlgmr.msra.gmra.mrb[8].mxu1 %vm1288_vm5, %v1300_v35 }
 0x48c   : > { %3767 = vmatpush3.bf16.xpose.msra.mxu1 %v1358_v36  ;;  %3768 = vmatprep.mubr.msk.bf16.mxu1 %vm4336_vm2, %v4335_v20 }
 0x48d   : > { %3772 = vmatprep.subr.bf16.mxu1 %v4335_v20 }
 0x490   : > { %3793 = vmatmul.mubr.msk.bf16.vlgmr.msra.gmra.mrb[8].mxu0 %vm1240_vm3, %v1574_v37 }
 0x491   : > { %3803 = vmatpush3.bf16.xpose.msra.mxu0 %v1708_v38  ;;  %3804 = vmatprep.mubr.msk.bf16.mxu0 %vm4336_vm2, %v4335_v20 }
 0x492   : > { %3814 = vmatprep.subr.bf16.mxu0 %v4335_v20 }
 0x493   : > { %3769 = vmatmul.mubr.msk.bf16.vlgmr.msra.gmra.mrb[12].mxu1 %vm1240_vm3, %v1350_v26 }
 0x494   : > { %3774 = vmatprep.mubr.msk.bf16.mxu1 %vm4336_vm2, %v4335_v20 }
 0x498   : > { %3805 = vmatmul.mubr.msk.bf16.vlgmr.msra.gmra.mrb[12].mxu0 %vm1240_vm3, %v4767_v1 }
 0x499   : > { %3815 = vmatpush3.bf16.xpose.msra.mxu0 %v1819_v41  ;;  %3816 = vmatprep.mubr.msk.bf16.mxu0 %vm4336_vm2, %v4335_v20 }
 0x49a   : > { %3826 = vmatprep.subr.bf16.mxu0 %v4335_v20 }
 0x4a0   : > { %3817 = vmatmul.mubr.msk.bf16.vlgmr.msra.gmra.mrb[16].mxu0 %vm1240_vm3, %v1811_v40 }
 0x4a1   : > { %3827 = vmatpush3.bf16.xpose.msra.mxu0 %v1931_v43  ;;  %3828 = vmatprep.mubr.msk.bf16.mxu0 %vm4336_vm2, %v4335_v20 }
 0x4a2   : > { %3838 = vmatprep.subr.bf16.mxu0 %v4335_v20 }
 0x4a8   : > { %3829 = vmatmul.mubr.msk.bf16.vlgmr.msra.gmra.mrb[20].mxu0 %vm1240_vm3, %v1924_v45 }
 0x4a9   : > { %3839 = vmatpush3.bf16.xpose.msra.mxu0 %v2042_v46  ;;  %3840 = vmatprep.mubr.msk.bf16.mxu0 %vm4336_vm2, %v4335_v20 }
 0x4aa   : > { %3850 = vmatprep.subr.bf16.mxu0 %v4335_v20 }
 0x4b0   : > { %3841 = vmatmul.mubr.msk.bf16.vlgmr.msra.gmra.mrb[24].mxu0 %vm1240_vm3, %v2035_v49 }
 0x4b1   : > { %3866 = vmatprep.mubr.msk.bf16.mxu0 %vm4336_vm2, %v4335_v20 }
 0x55b   : > { %v1506_v51 = vpop.f32.mrb[4].mxu0 }
 0x55c   : > { %v1512_v52 = vmul.f32 0.17677669, %v1506_v51  ;;  %v3782_v53 = vpop.f32.mrb[5].mxu0 }
 0x55d   : > { %v1509_v54 = vpop.f32.mrb[6].mxu0 }
 0x55e   : > { %v4829_v55 = vpop.f32.mrb[8].mxu1  ;;  %v3783_v56 = vpop.f32.mrb[7].mxu0  ;;  %v1513_v57 = vsel %vm1288_vm5, %v1512_v52, -inf }
 0x55f   : > { %1514 = vmax.xlane.f32.xlu0 %v1513_v57  ;;  %v3764_v58 = vpop.f32.mrb[9].mxu1 }
 0x560   : > { %v1345_v59 = vpop.f32.mrb[10].mxu1 }
 0x561   : > { %v3765_v60 = vpop.f32.mrb[11].mxu1 }
 0x563   : > { %v1617_v61 = vpop.f32.mrb[8].mxu0 }
 0x564   : > { %v1623_v62 = vmul.f32 0.17677669, %v1617_v61  ;;  %v3794_v63 = vpop.f32.mrb[9].mxu0 }
 0x565   : > { %v1620_v0 = vpop.f32.mrb[10].mxu0 }
 0x566   : > { %v1394_v1 = vpop.f32.mrb[12].mxu1  ;;  %v3795_v3 = vpop.f32.mrb[11].mxu0  ;;  %v1624_v4 = vsel %vm1288_vm5, %v1623_v62, -inf }
 0x567   : > { %v1400_v5 = vmul.f32 0.17677669, %v1394_v1  ;;  %1625 = vmax.xlane.f32.xlu0 %v1624_v4  ;;  %v3770_v6 = vpop.f32.mrb[13].mxu1 }
 0x568   : > { %v1397_v7 = vpop.f32.mrb[14].mxu1 }
 0x569   : > { %v3771_v10 = vpop.f32.mrb[15].mxu1  ;;  %v1401_v11 = vsel %vm1288_vm5, %v1400_v5, -inf }
 0x56a   : > { %1402 = vmax.xlane.f32.xlu1 %v1401_v11 }
 0x56b   : > { %v1744_v12 = vpop.f32.mrb[12].mxu0 }
 0x56c   : > { %v1750_v13 = vmul.f32 0.17677669, %v1744_v12  ;;  %v3806_v14 = vpop.f32.mrb[13].mxu0 }
 0x56d   : > { %v1747_v15 = vpop.f32.mrb[14].mxu0 }
 0x56e   : > { %v3807_v16 = vpop.f32.mrb[15].mxu0  ;;  %v1751_v17 = vsel %vm1288_vm5, %v1750_v13, -inf  ;;  %v1703_v15 = vpack.c.bf16 %v4778_v9, %v4778_v9 }
 0x56f   : > { %1752 = vmax.xlane.f32.xlu1 %v1751_v17 }
 0x573   : > { %v1855_v18 = vpop.f32.mrb[16].mxu0 }
 0x574   : > { %v1861_v21 = vmul.f32 0.17677669, %v1855_v18  ;;  %v3818_v22 = vpop.f32.mrb[17].mxu0 }
 0x575   : > { %v1858_v23 = vpop.f32.mrb[18].mxu0 }
 0x576   : > { %v3819_v24 = vpop.f32.mrb[19].mxu0  ;;  %v1862_v25 = vsel %vm1288_vm5, %v1861_v21, -inf }
 0x577   : > { %1863 = vmax.xlane.f32.xlu0 %v1862_v25 }
 0x57b   : > { %v1967_v26 = vpop.f32.mrb[20].mxu0 }
 0x57c   : > { %v1973_v27 = vmul.f32 0.17677669, %v1967_v26  ;;  %v3830_v28 = vpop.f32.mrb[21].mxu0 }
 0x57d   : > { %v1970_v29 = vpop.f32.mrb[22].mxu0 }
 0x57e   : > { %v3831_v30 = vpop.f32.mrb[23].mxu0  ;;  %v1974_v31 = vsel %vm1288_vm5, %v1973_v27, -inf }
 0x57f   : > { %1975 = vmax.xlane.f32.xlu1 %v1974_v31 }
 0x583   : > { %v2078_v32 = vpop.f32.mrb[24].mxu0 }
 0x584   : > { %v2084_v33 = vmul.f32 0.17677669, %v2078_v32  ;;  %v3842_v34 = vpop.f32.mrb[25].mxu0 }
 0x585   : > { %v2081_v35 = vpop.f32.mrb[26].mxu0 }
 0x586   : > { %v3843_v36 = vpop.f32.mrb[27].mxu0  ;;  %v2085_v37 = vsel %vm1288_vm5, %v2084_v33, -inf }
 0x587   : > { %2086 = vmax.xlane.f32.xlu0 %v2085_v37 }
 0x5ec   : > { %v1515_v38 = vpop.xlane.xlu0 %1514 }
 0x5ed   : > { %v1516_v39 = vsub.f32 %v1512_v52, %v1515_v38  ;;  %v1767_v38 = vsel %vm1304_vm4, %v1703_v15, 0 }
 0x5ef   : > { %v1517_v40 = vmul.f32 1.442695, %v1516_v39 }
 0x5f1   : > { %4127 = vpow2.f32 %v1517_v40 }
 0x5f4   : > { %v1626_v41 = vpop.xlane.xlu0 %1625 }
 0x5f5   : > { %v1627_v42 = vsub.f32 %v1623_v62, %v1626_v41 }
 0x5f7   : > { %v1628_v43 = vmul.f32 1.442695, %v1627_v42  ;;  %v1403_v44 = vpop.xlane.xlu1 %1402 }
 0x5f8   : > { %v1404_v45 = vsub.f32 %v1400_v5, %v1403_v44 }
 0x5f9   : > { %4129 = vpow2.f32 %v1628_v43 }
 0x5fa   : > { %v1405_v46 = vmul.f32 1.442695, %v1404_v45 }
 0x5fb   : > { %v4838_v49 = vpop.eup %4127 }
 0x5fc   : > { %4131 = vpow2.f32 %v1405_v46  ;;  %v1753_v51 = vpop.xlane.xlu1 %1752  ;;  %v1519_v53 = vsel %vm1288_vm5, %v4838_v49, 0.0 }
 0x5fd   : > { %v1754_v54 = vsub.f32 %v1750_v13, %v1753_v51  ;;  %1520 = vadd.xlane.f32.xlu0 %v1519_v53 }
 0x5ff   : > { %v1755_v56 = vmul.f32 1.442695, %v1754_v54 }
 0x601   : > { %4133 = vpow2.f32 %v1755_v56 }
 0x603   : > { %v4842_v52 = vpop.eup %4129 }
 0x604   : > { %v1864_v57 = vpop.xlane.xlu0 %1863  ;;  %v1630_v58 = vsel %vm1288_vm5, %v4842_v52, 0.0 }
 0x605   : > { %v1865_v59 = vsub.f32 %v1861_v21, %v1864_v57  ;;  %1631 = vadd.xlane.f32.xlu1 %v1630_v58 }
 0x606   : > { %v4132_v60 = vpop.eup %4131 }
 0x607   : > { %v1866_v61 = vmul.f32 1.442695, %v1865_v59  ;;  %v1407_v62 = vsel %vm1288_vm5, %v4132_v60, 0.0 }
 0x609   : > { %4135 = vpow2.f32 %v1866_v61  ;;  %1408 = vadd.xlane.f32.xlu1 %v1407_v62  ;;  %v4035_v62 = vld [vmem:[%s4648_s29] sm:$0xff]  }
 0x60a   : > { %3851 = vmatpush3.bf16.msra.mxu0 %v4035_v62 }
 0x60b   : > { %v4847_v63 = vpop.eup %4133  ;;  %3852 = vmatprep.subr.bf16.mxu0 %v4335_v20 }
 0x60c   : > { %v1757_v0 = vsel %vm1288_vm5, %v4847_v63, 0.0  ;;  %v1976_v4 = vpop.xlane.xlu1 %1975 }
 0x60d   : > { %1758 = vadd.xlane.f32.xlu0 %v1757_v0  ;;  %v1977_v5 = vsub.f32 %v1973_v27, %v1976_v4 }
 0x60f   : > { %v1978_v6 = vmul.f32 1.442695, %v1977_v5 }
 0x611   : > { %4137 = vpow2.f32 %v1978_v6 }
 0x613   : > { %v4851_v1 = vpop.eup %4135 }
 0x614   : > { %v1868_v3 = vsel %vm1288_vm5, %v4851_v1, 0.0  ;;  %v2087_v7 = vpop.xlane.xlu0 %2086 }
 0x615   : > { %1869 = vadd.xlane.f32.xlu0 %v1868_v3  ;;  %v2088_v10 = vsub.f32 %v2084_v33, %v2087_v7 }
 0x617   : > { %v2089_v12 = vmul.f32 1.442695, %v2088_v10 }
 0x619   : > { %4139 = vpow2.f32 %v2089_v12 }
 0x61a   : > { %1414 = vrot.lane.b32.xlu1 %v4776_v8, %s4337_s15 }
 0x61b   : > { %v4861_v11 = vpop.eup %4137 }
 0x61c   : > { %v1980_v13 = vsel %vm1288_vm5, %v4861_v11, 0.0 }
 0x623   : > { %v4865_v14 = vpop.eup %4139 }
 0x624   : > { %v2091_v16 = vsel %vm1288_vm5, %v4865_v14, 0.0 }
 0x62b   : > { %1525 = vrot.lane.b32.xlu0 %v4776_v8, %s4338_s27 }
 0x62f   : > { %1636 = vrot.lane.b32.xlu0 %v4776_v8, %s4339_s28 }
 0x63e   : > { %1981 = vadd.xlane.f32.xlu1 %v1980_v13 }
 0x64e   : > { %2092 = vadd.xlane.f32.xlu0 %v2091_v16 }
 0x64f   : > { %1875 = vrot.lane.b32.xlu1 %v1703_v15, %s4337_s15 }
 0x653   : > { %2097 = vrot.lane.b32.xlu1 %v1703_v15, %s4339_s28 }
 0x664   : > { %1986 = vrot.lane.b32.xlu0 %v1703_v15, %s4338_s27 }
 0x68a   : > { %v1521_v18 = vpop.xlane.xlu0 %1520 }
 0x692   : > { %v1632_v8 = vpop.xlane.xlu1 %1631 }
 0x696   : > { %v1409_v17 = vpop.xlane.xlu1 %1408 }
 0x697   : > { %4141 = vrcp.f32 %v1409_v17  ;;  %v4036_v17 = vld [vmem:[%s4648_s29 + $0x8] sm:$0xff]  }
 0x698   : > { %4143 = vrcp.f32 %v1521_v18  ;;  %3853 = vmatpush3.bf16.msra.mxu0 %v4036_v17  ;;  %v4037_v18 = vld [vmem:[%s4648_s29 + $0x10] sm:$0xff]  }
 0x699   : > { %4145 = vrcp.f32 %v1632_v8  ;;  %3854 = vmatprep.subr.bf16.mxu0 %v4335_v20 }
 0x69a   : > { %v1415_v21 = vpop.permute.xlu1 %1414  ;;  %v1759_v9 = vpop.xlane.xlu0 %1758 }
 0x69b   : > { %v1420_v22 = vsel %vm1304_vm4, %v1415_v21, 0  ;;  %4147 = vrcp.f32 %v1759_v9  ;;  %v4038_v21 = vld [vmem:[%s4648_s29 + $0x18] sm:$0xff]  }
 0x69c   : > { %3773 = vmatpush3.bf16.msra.mxu1 %v1420_v22  ;;  %3855 = vmatpush3.bf16.msra.mxu0 %v4037_v18 }
 0x69d   : > { %3784 = vmatprep.subr.bf16.mxu1 %v4335_v20  ;;  %3856 = vmatprep.subr.bf16.mxu0 %v4335_v20 }
 0x6a0   : > { %3857 = vmatpush3.bf16.msra.mxu0 %v4038_v21 }
 0x6a1   : > { %v4142_v23 = vpop.eup %4141  ;;  %3858 = vmatprep.subr.bf16.mxu0 %v4335_v20 }
 0x6a2   : > { %v1411_v24 = vmul.f32 %v4142_v23, %v4132_v60  ;;  %v1870_v25 = vpop.xlane.xlu0 %1869  ;;  %v4144_v27 = vpop.eup %4143 }
 0x6a3   : > { %v1523_v30 = vmul.f32 %v4144_v27, %v4838_v49  ;;  %v4146_v33 = vpop.eup %4145  ;;  %4149 = vrcp.f32 %v1870_v25  ;;  %v4040_v27 = vld [vmem:[%s4648_s29 + $0x28] sm:$0xff]  }
 0x6a4   : > { %v1412_v26 = vpack.c.bf16 %v1411_v24, %v1411_v24  ;;  %v1634_v35 = vmul.f32 %v4146_v33, %v4842_v52  ;;  %v4039_v24 = vld [vmem:[%s4648_s29 + $0x20] sm:$0xff]  }
 0x6a5   : > { %v1524_v32 = vpack.c.bf16 %v1523_v30, %v1523_v30  ;;  %v4148_v37 = vpop.eup %4147  ;;  %3859 = vmatpush3.bf16.msra.mxu0 %v4039_v24  ;;  %v4060_v24 = vld [vmem:[%s4633_s16 + $0x4c] ss:$16 sps:$4 sm:$0xff]  }
 0x6a6   : > { %v1526_v28 = vpop.permute.xlu0 %1525  ;;  %3775 = vmatmul.mubr.msk.bf16.vlgmr.msra.gmra.mrb[16].mxu1 %vm1288_vm5, %v1412_v26  ;;  %v1635_v36 = vpack.c.bf16 %v1634_v35, %v1634_v35  ;;  %v1761_v39 = vmul.f32 %v4148_v37, %v4847_v63  ;;  %3860 = vmatprep.subr.bf16.mxu0 %v4335_v20 }
 0x6a7   : > { %v1531_v29 = vsel %vm1304_vm4, %v1526_v28, 0  ;;  %3786 = vmatprep.mubr.msk.bf16.mxu1 %vm4336_vm2, %v4335_v20  ;;  %v4041_v28 = vld [vmem:[%s4648_s29 + $0x30] sm:$0xff]  }
 0x6a8   : > { %3785 = vmatpush3.bf16.msra.mxu1 %v1531_v29  ;;  %v1762_v40 = vpack.c.bf16 %v1761_v39, %v1761_v39  ;;  %v4042_v29 = vld [vmem:[%s4648_s29 + $0x38] sm:$0xff]   ;;  %s5202_s29 = sld [smem:[#allocation28_spill]] (!%p3596_p7) }
 0x6a9   : > { %3796 = vmatprep.subr.bf16.mxu1 %v4335_v20  ;;  %3861 = vmatpush3.bf16.msra.mxu0 %v4040_v27  ;;  %v4063_v27 = vld [vmem:[%s4633_s16 + $0x64] ss:$16 sps:$4 sm:$0xff]  }
 0x6aa   : > { %v1637_v31 = vpop.permute.xlu0 %1636  ;;  %3862 = vmatprep.subr.bf16.mxu0 %v4335_v20 }
 0x6ab   : > { %v1642_v34 = vsel %vm1304_vm4, %v1637_v31, 0 }
 0x6ad   : > { %v4150_v41 = vpop.eup %4149  ;;  %3863 = vmatpush3.bf16.msra.mxu0 %v4041_v28  ;;  %v4066_v28 = vld [vmem:[%s4633_s16 + $0x6c] ss:$16 sps:$4 sm:$0xff]  }
 0x6ae   : > { %3787 = vmatmul.mubr.msk.bf16.vlgmr.msra.gmra.mrb[20].mxu1 %vm1288_vm5, %v1524_v32  ;;  %v1872_v43 = vmul.f32 %v4150_v41, %v4851_v1  ;;  %3864 = vmatprep.subr.bf16.mxu0 %v4335_v20 }
 0x6af   : > { %3797 = vmatpush3.bf16.msra.mxu1 %v1642_v34  ;;  %3798 = vmatprep.mubr.msk.bf16.mxu1 %vm4336_vm2, %v4335_v20 }
 0x6b0   : > { %3808 = vmatprep.subr.bf16.mxu1 %v4335_v20  ;;  %v1873_v46 = vpack.c.bf16 %v1872_v43, %v1872_v43 }
 0x6b1   : > { %3865 = vmatpush3.bf16.msra.mxu0 %v4042_v29  ;;  %v4061_v29 = vld [vmem:[%s4633_s16 + $0x60] ss:$16 sps:$4 sm:$0xff]  }
 0x6b6   : > { %3799 = vmatmul.mubr.msk.bf16.vlgmr.msra.gmra.mrb[24].mxu1 %vm1288_vm5, %v1635_v36 }
 0x6b7   : > { %3809 = vmatpush3.bf16.msra.mxu1 %v1767_v38  ;;  %3810 = vmatprep.mubr.msk.bf16.mxu1 %vm4336_vm2, %v4335_v20 }
 0x6b8   : > { %3820 = vmatprep.subr.bf16.mxu1 %v4335_v20 }
 0x6be   : > { %3811 = vmatmul.mubr.msk.bf16.vlgmr.msra.gmra.mrb[28].mxu1 %vm1288_vm5, %v1762_v40 }
 0x6bf   : > { %3822 = vmatprep.mubr.msk.bf16.mxu1 %vm4336_vm2, %v4335_v20 }
 0x6cb   : > { %v1982_v42 = vpop.xlane.xlu1 %1981 }
 0x6cc   : > { %4151 = vrcp.f32 %v1982_v42 }
 0x6cf   : > { %v1876_v44 = vpop.permute.xlu1 %1875 }
 0x6d0   : > { %v1881_v45 = vsel %vm1304_vm4, %v1876_v44, 0 }
 0x6d1   : > { %3821 = vmatpush3.bf16.msra.mxu1 %v1881_v45 }
 0x6d2   : > { %3832 = vmatprep.subr.bf16.mxu1 %v4335_v20 }
 0x6d3   : > { %v2098_v52 = vpop.permute.xlu1 %2097 }
 0x6d4   : > { %3823 = vmatmul.mubr.msk.bf16.vlgmr.msra.gmra.mrb[32].mxu1 %vm1288_vm5, %v1873_v46  ;;  %v2103_v58 = vsel %vm1304_vm4, %v2098_v52, 0 }
 0x6d5   : > { %3834 = vmatprep.mubr.msk.bf16.mxu1 %vm4336_vm2, %v4335_v20 }
 0x6d6   : > { %v4152_v49 = vpop.eup %4151 }
 0x6d7   : > { %v1984_v53 = vmul.f32 %v4152_v49, %v4861_v11 }
 0x6d9   : > { %v1985_v57 = vpack.c.bf16 %v1984_v53, %v1984_v53 }
 0x6db   : > { %v2093_v51 = vpop.xlane.xlu0 %2092 }
 0x6dc   : > { %4153 = vrcp.f32 %v2093_v51 }
 0x6df   : > { %v1987_v54 = vpop.permute.xlu0 %1986 }
 0x6e0   : > { %v1992_v56 = vsel %vm1304_vm4, %v1987_v54, 0 }
 0x6e1   : > { %3833 = vmatpush3.bf16.msra.mxu1 %v1992_v56 }
 0x6e2   : > { %3844 = vmatprep.subr.bf16.mxu1 %v4335_v20 }
 0x6e4   : > { %3835 = vmatmul.mubr.msk.bf16.vlgmr.msra.gmra.mrb[36].mxu1 %vm1288_vm5, %v1985_v57 }
 0x6e5   : > { %3845 = vmatpush3.bf16.msra.mxu1 %v2103_v58  ;;  %3846 = vmatprep.mubr.msk.bf16.mxu1 %vm4336_vm2, %v4335_v20 }
 0x6e6   : > { %v4154_v59 = vpop.eup %4153 }
 0x6e7   : > { %v2095_v60 = vmul.f32 %v4154_v59, %v4865_v14 }
 0x6e9   : > { %v2096_v61 = vpack.c.bf16 %v2095_v60, %v2095_v60 }
 0x6ec   : > { %3847 = vmatmul.mubr.msk.bf16.vlgmr.msra.gmra.mrb[40].mxu1 %vm1288_vm5, %v2096_v61 }
 0x6ed   : > { %2563 = vmatprep.mubr.bf16.mxu1 %v4334_v19 }
 0x779   : > { %v1456_v63 = vpop.f32.mrb[16].mxu1 }
 0x77a   : > { %v3776_v0 = vpop.f32.mrb[17].mxu1 }
 0x77b   : > { %v1459_v1 = vpop.f32.mrb[18].mxu1 }
 0x77c   : > { %v3777_v3 = vpop.f32.mrb[19].mxu1  ;;  %v4163_v1 = vld [vmem:[#allocation2] sm:$0xff] }
 0x781   : > { %v1567_v4 = vpop.f32.mrb[20].mxu1 }
 0x782   : > { %v3788_v5 = vpop.f32.mrb[21].mxu1 }
 0x783   : > { %v1570_v6 = vpop.f32.mrb[22].mxu1  ;;  %v4043_v5 = vld [vmem:[%s4633_s16] ss:$16 sps:$4 sm:$0xff]  }
 0x784   : > { %v3789_v7 = vpop.f32.mrb[23].mxu1  ;;  %v4045_v6 = vld [vmem:[%s4633_s16 + $0x4] ss:$16 sps:$4 sm:$0xff]  }
 0x785   : > { %v4046_v7 = vld [vmem:[%s4633_s16 + $0x8] ss:$16 sps:$4 sm:$0xff]   ;;  %2531 = vmatprep.subr.bf16.mxu1 %v4045_v6 }
 0x786   : > { %2532 = vmatpush1.bf16.msra.mxu1 %v4043_v5  ;;  %v4095_v6 = vld [vmem:[%s4685_s12 + $0x48] sm:$0xff]  }
 0x789   : > { %v1678_v10 = vpop.f32.mrb[24].mxu1 }
 0x78a   : > { %v3800_v11 = vpop.f32.mrb[25].mxu1 }
 0x78b   : > { %v1681_v12 = vpop.f32.mrb[26].mxu1  ;;  %v4051_v11 = vld [vmem:[%s4633_s16 + $0x24] ss:$16 sps:$4 sm:$0xff]  }
 0x78c   : > { %v3801_v13 = vpop.f32.mrb[27].mxu1  ;;  %v4054_v12 = vld [vmem:[%s4633_s16 + $0x2c] ss:$16 sps:$4 sm:$0xff]   ;;  %2533 = vmatprep.subr.bf16.mxu1 %v4051_v11 }
 0x78d   : > { %v4049_v13 = vld [vmem:[%s4633_s16 + $0x20] ss:$16 sps:$4 sm:$0xff]   ;;  %v4098_v11 = vld [vmem:[%s4685_s12 + $0x88] sm:$0xff]  }
 0x78e   : > { %2534 = vmatpush1.bf16.msra.mxu1 %v4049_v13  ;;  %v4100_v13 = vld [vmem:[%s4685_s12 + $0xd0] sm:$0xff]  }
 0x791   : > { %v1803_v14 = vpop.f32.mrb[28].mxu1 }
 0x792   : > { %v3812_v15 = vpop.f32.mrb[29].mxu1 }
 0x793   : > { %v1806_v16 = vpop.f32.mrb[30].mxu1 }
 0x794   : > { %v3813_v8 = vpop.f32.mrb[31].mxu1 }
 0x7a7   : > { %v1917_v22 = vpop.f32.mrb[32].mxu1 }
 0x7a8   : > { %v3988_v9 = vpack.i.bf16 %v1917_v22, %v1456_v63  ;;  %v3824_v23 = vpop.f32.mrb[33].mxu1 }
 0x7a9   : > { %v1920_v25 = vpop.f32.mrb[34].mxu1  ;;  %v4057_v23 = vld [vmem:[%s4633_s16 + $0x44] ss:$16 sps:$4 sm:$0xff]  }
 0x7aa   : > { %3989 = vrot.lane.b32.xlu1 %v3988_v9, %s4339_s28  ;;  %v3825_v26 = vpop.f32.mrb[35].mxu1  ;;  %v4055_v25 = vld [vmem:[%s4633_s16 + $0x40] ss:$16 sps:$4 sm:$0xff]   ;;  %2535 = vmatprep.subr.bf16.mxu1 %v4057_v23 }
 0x7ab   : > { %v4058_v26 = vld [vmem:[%s4633_s16 + $0x48] ss:$16 sps:$4 sm:$0xff]   ;;  %2536 = vmatpush1.bf16.msra.mxu1 %v4055_v25  ;;  %v4110_v23 = vld [vmem:[%s4685_s12 + $0xa0] sm:$0xff]  }
 0x7ac   : > { %2537 = vmatprep.subr.bf16.mxu1 %v4063_v27  ;;  %v4112_v25 = vld [vmem:[%s4685_s12 + $0xe8] sm:$0xff]  }
 0x7ad   : > { %v4114_v27 = vld [vmem:[%s4685_s12 + $0xa8] sm:$0xff]  }
 0x7af   : > { %2538 = vmatpush1.bf16.msra.mxu1 %v4061_v29  ;;  %v4116_v29 = vld [vmem:[%s4685_s12 + $0xf0] sm:$0xff]  }
 0x7b7   : > { %v2028_v30 = vpop.f32.mrb[36].mxu1 }
 0x7b8   : > { %v3993_v31 = vpack.i.bf16 %v2028_v30, %v1567_v4  ;;  %v3836_v32 = vpop.f32.mrb[37].mxu1  ;;  %v4064_v30 = vld [vmem:[%s4633_s16 + $0x68] ss:$16 sps:$4 sm:$0xff]  }
 0x7b9   : > { %v2031_v33 = vpop.f32.mrb[38].mxu1  ;;  %v4072_v32 = vld [vmem:[%s4633_s16 + $0x8c] ss:$16 sps:$4 sm:$0xff]  }
 0x7ba   : > { %3994 = vrot.lane.b32.xlu1 %v3993_v31, %s4338_s27  ;;  %v3837_v34 = vpop.f32.mrb[39].mxu1  ;;  %v4069_v31 = vld [vmem:[%s4633_s16 + $0x84] ss:$16 sps:$4 sm:$0xff]   ;;  %v4067_v33 = vld [vmem:[%s4633_s16 + $0x80] ss:$16 sps:$4 sm:$0xff]  }
 0x7bb   : > { %v4070_v34 = vld [vmem:[%s4633_s16 + $0x88] ss:$16 sps:$4 sm:$0xff]   ;;  %2539 = vmatprep.subr.bf16.mxu1 %v4069_v31  ;;  %v4118_v31 = vld [vmem:[%s4685_s12 + $0xb0] sm:$0xff]  }
 0x7bc   : > { %2540 = vmatpush1.bf16.msra.mxu1 %v4067_v33  ;;  %v4120_v33 = vld [vmem:[%s4685_s12 + $0xf8] sm:$0xff]  }
 0x7bf   : > { %v2139_v35 = vpop.f32.mrb[40].mxu1 }
 0x7c0   : > { %v3998_v36 = vpack.i.bf16 %v2139_v35, %v1678_v10  ;;  %v3848_v37 = vpop.f32.mrb[41].mxu1  ;;  %v4048_v10 = vld [vmem:[%s4633_s16 + $0xc] ss:$16 sps:$4 sm:$0xff]   ;;  %v4075_v35 = vld [vmem:[%s4633_s16 + $0xa4] ss:$16 sps:$4 sm:$0xff]  }
 0x7c1   : > { %v2142_v38 = vpop.f32.mrb[42].mxu1  ;;  %2574 = vmatprep.subr.bf16.mxu0 %v4048_v10  ;;  %v4073_v37 = vld [vmem:[%s4633_s16 + $0xa0] ss:$16 sps:$4 sm:$0xff]   ;;  %2541 = vmatprep.subr.bf16.mxu1 %v4075_v35  ;;  %v4097_v10 = vld [vmem:[%s4685_s12 + $0x8] sm:$0xff]   ;;  %v4122_v35 = vld [vmem:[%s4685_s12 + $0xb8] sm:$0xff]  }
 0x7c2   : > { %3999 = vrot.lane.b32.xlu1 %v3998_v36, %s4337_s15  ;;  %v3849_v39 = vpop.f32.mrb[43].mxu1  ;;  %v4078_v36 = vld [vmem:[%s4633_s16 + $0xac] ss:$16 sps:$4 sm:$0xff]   ;;  %v4076_v38 = vld [vmem:[%s4633_s16 + $0xa8] ss:$16 sps:$4 sm:$0xff]   ;;  %2542 = vmatpush1.bf16.msra.mxu1 %v4073_v37  ;;  %v2365_v37 = vsub.s32 3, %v4747_v47 }
 0x7c3   : > { %v4081_v39 = vld [vmem:[%s4633_s16 + $0xc4] ss:$16 sps:$4 sm:$0xff]  }
 0x7c4   : > { %2543 = vmatprep.subr.bf16.mxu1 %v4081_v39 }
 0x81c   : > { %v3990_v40 = vpop.permute.xlu1 %3989 }
 0x81d   : > { %v3992_v42 = vunpack.i.h.bf16 %v3990_v40  ;;  %v3991_v20 = vunpack.i.l.bf16 %v3990_v40  ;;  %v4084_v40 = vld [vmem:[%s4633_s16 + $0xcc] ss:$16 sps:$4 sm:$0xff]  }
 0x81f   : > { %v2157_v46 = vsel %vm1240_vm3, %v1803_v14, %v3992_v42  ;;  %v1696_v49 = vsel %vm1240_vm3, %v4829_v55, %v3991_v20  ;;  %v3518_v55 = vld [vmem:[%s5195_s3] ss:$0 sm:$0xff]  ;;  %v4052_v14 = vld [vmem:[%s4633_s16 + $0x28] ss:$16 sps:$4 sm:$0xff]   ;;  %v4087_v20 = vld [vmem:[%s4633_s16 + $0xe4] ss:$16 sps:$4 sm:$0xff]  }
 0x820   : > { %v4082_v42 = vld [vmem:[%s4633_s16 + $0xc8] ss:$16 sps:$4 sm:$0xff]   ;;  %s5200_s3 = sld [smem:[#allocation29_spill]] (!%p3596_p7) }
 0x82c   : > { %v3995_v41 = vpop.permute.xlu1 %3994 }
 0x82d   : > { %v3997_v43 = vunpack.i.h.bf16 %v3995_v41  ;;  %v3996_v44 = vunpack.i.l.bf16 %v3995_v41  ;;  %v4079_v41 = vld [vmem:[%s4633_s16 + $0xc0] ss:$16 sps:$4 sm:$0xff]  }
 0x82e   : > { %2544 = vmatpush1.bf16.msra.mxu1 %v4079_v41 }
 0x82f   : > { %v2158_v54 = vsel %vm1697_vm6, %v2157_v46, %v3997_v43  ;;  %v1698_v56 = vsel %vm1697_vm6, %v1696_v49, %v3996_v44  ;;  %v4090_v43 = vld [vmem:[%s4633_s16 + $0xec] ss:$16 sps:$4 sm:$0xff]   ;;  %v4085_v44 = vld [vmem:[%s4633_s16 + $0xe0] ss:$16 sps:$4 sm:$0xff]   ;;  %2545 = vmatprep.subr.bf16.mxu1 %v4087_v20 }
 0x830   : > { %v4091_v46 = vld [vmem:[%s4685_s12 + $0x40] sm:$0xff]  }
 0x831   : > { %v4092_v49 = vld [vmem:[%s4685_s12 + $0xc0] sm:$0xff]  }
 0x832   : > { %2546 = vmatpush1.bf16.msra.mxu1 %v4085_v44 }
 0x833   : > { %3670 = vmatprep.subr.bf16.mxu1 %v4091_v46 }
 0x834   : > { %v4000_v45 = vpop.permute.xlu1 %3999 }
 0x835   : > { %v4002_v51 = vunpack.i.h.bf16 %v4000_v45  ;;  %v4001_v53 = vunpack.i.l.bf16 %v4000_v45  ;;  %v4088_v45 = vld [vmem:[%s4633_s16 + $0xe8] ss:$16 sps:$4 sm:$0xff]   ;;  %s5201_s16 = smov (!%p3596_p7), %s5200_s3 }
 0x837   : > { %v2159_v52 = vsel %vm1699_vm7, %v2158_v54, %v4002_v51  ;;  %v1700_v57 = vsel %vm1699_vm7, %v1698_v56, %v4001_v53 }
 0x838   : > { %v2160_v58 = vpack.c.bf16 %v2159_v52, %v1700_v57 }
 0x83a   : > { %3867 = vmatmul.mubr.bf16.vlgmr.msra.gmra.mrb[28].mxu0 %v2160_v58 }
 0x83b   : > { %2606 = vmatprep.mubr.bf16.mxu0 %v4334_v19  ;;  %v4164_v19 = vld [vmem:[#allocation2 + $0x8] sm:$0xff]  ;;  %2575 = vmatpush1.bf16.msra.mxu0 %v4046_v7  ;;  %v4096_v7 = vld [vmem:[%s4685_s12 + $0xc8] sm:$0xff]  }
 0x83c   : > { %2576 = vmatprep.subr.bf16.mxu0 %v4054_v12  ;;  %v4099_v12 = vld [vmem:[%s4685_s12 + $0x50] sm:$0xff]  }
 0x83f   : > { %2577 = vmatpush1.bf16.msra.mxu0 %v4052_v14  ;;  %v4101_v14 = vld [vmem:[%s4685_s12 + $0x10] sm:$0xff]  }
 0x840   : > { %2578 = vmatprep.subr.bf16.mxu0 %v4060_v24  ;;  %v4111_v24 = vld [vmem:[%s4685_s12 + $0x68] sm:$0xff]  }
 0x843   : > { %2579 = vmatpush1.bf16.msra.mxu0 %v4058_v26  ;;  %v4113_v26 = vld [vmem:[%s4685_s12 + $0x28] sm:$0xff]  }
 0x844   : > { %2580 = vmatprep.subr.bf16.mxu0 %v4066_v28  ;;  %v4115_v28 = vld [vmem:[%s4685_s12 + $0x70] sm:$0xff]  }
 0x847   : > { %2581 = vmatpush1.bf16.msra.mxu0 %v4064_v30  ;;  %v4117_v30 = vld [vmem:[%s4685_s12 + $0x30] sm:$0xff]  }
 0x848   : > { %2582 = vmatprep.subr.bf16.mxu0 %v4072_v32  ;;  %v4119_v32 = vld [vmem:[%s4685_s12 + $0x78] sm:$0xff]  }
 0x84b   : > { %2583 = vmatpush1.bf16.msra.mxu0 %v4070_v34  ;;  %v4121_v34 = vld [vmem:[%s4685_s12 + $0x38] sm:$0xff]  }
 0x84c   : > { %2584 = vmatprep.subr.bf16.mxu0 %v4078_v36  ;;  %v2349_v36 = vld [vmem:[%s4671_s6] sm:$0xf] }
 0x84d   : > { %v2362_v39 = vrot.slane %v2349_v36, %v1020_v2  ;;  %v2366_v41 = vrot.slane %v2349_v36, %v2365_v37 }
 0x84f   : > { %2585 = vmatpush1.bf16.msra.mxu0 %v4076_v38  ;;  %v2354_v38 = vrot.slane %v2349_v36, %v1012_v50 }
 0x850   : > { %2586 = vmatprep.subr.bf16.mxu0 %v4084_v40  ;;  %v2358_v40 = vrot.slane %v2349_v36, %v1016_v48 }
 0x853   : > { %2587 = vmatpush1.bf16.msra.mxu0 %v4082_v42 }
 0x854   : > { %2588 = vmatprep.subr.bf16.mxu0 %v4090_v43 }
 0x857   : > { %2589 = vmatpush1.bf16.msra.mxu0 %v4088_v45 }
 0x858   : > { %3692 = vmatprep.subr.bf16.mxu0 %v4092_v49 }
 0x90d   : > { %v2266_v59 = vpop.f32.mrb[28].mxu0 }
 0x90e   : > { %v2267_v60 = vadd.f32 %v3518_v55, %v2266_v59  ;;  %v3868_v61 = vpop.f32.mrb[29].mxu0  ;;  %v3527_v59 = vld [vmem:[%s5196_s21] ss:$0 sm:$0xff] }
 0x90f   : > { %v2269_v62 = vpop.f32.mrb[30].mxu0 }
 0x910   : > { %v2270_v63 = vadd.f32 %v3518_v55, %v2269_v62  ;;  %v3869_v0 = vpop.f32.mrb[31].mxu0  ;;  %v2273_v3 = vadd.f32 %v4163_v1, %v2267_v60 }
 0x912   : > { %2275 = vadd.xlane.f32.xlu0 %v2273_v3  ;;  %v2274_v4 = vadd.f32 %v4164_v19, %v2270_v63  ;;  %v3528_v63 = vld [vmem:[%s881_s22] ss:$0 sm:$0xff]  ;;  %v4093_v19 = vld [vmem:[%s4685_s12] sm:$0xff]  }
 0x914   : > { %2277 = vadd.xlane.f32.xlu1 %v2274_v4 }
 0x99f   : > { %v2276_v15 = vpop.xlane.xlu0 %2275 }
 0x9a0   : > { %v2280_v16 = vmul.f32 0.0078125, %v2276_v15  ;;  %v4102_v15 = vld [vmem:[%s4685_s12 + $0x90] sm:$0xff]  }
 0x9a1   : > { %v2278_v8 = vpop.xlane.xlu1 %2277 }
 0x9a2   : > { %v4950_v17 = vsub.f32 %v2273_v3, %v2280_v16  ;;  %v2281_v18 = vmul.f32 0.0078125, %v2278_v8  ;;  %v4103_v16 = vld [vmem:[%s4685_s12 + $0x58] sm:$0xff]  }
 0x9a3   : > { %v4104_v8 = vld [vmem:[%s4685_s12 + $0xd8] sm:$0xff]  }
 0x9a4   : > { %v4952_v21 = vsub.f32 %v2274_v4, %v2281_v18  ;;  %v2284_v22 = vmul.f32 %v4950_v17, %v4950_v17  ;;  %v4094_v4 = vld [vmem:[%s4685_s12 + $0x80] sm:$0xff]   ;;  %v4106_v18 = vld [vmem:[%s4685_s12 + $0x98] sm:$0xff]  }
 0x9a6   : > { %2286 = vadd.xlane.f32.xlu0 %v2284_v22  ;;  %v2285_v9 = vmul.f32 %v4952_v21, %v4952_v21  ;;  %v4108_v22 = vld [vmem:[%s4685_s12 + $0xe0] sm:$0xff]  }
 0x9aa   : > { %2288 = vadd.xlane.f32.xlu0 %v2285_v9  ;;  %v4109_v9 = vld [vmem:[%s4685_s12 + $0x20] sm:$0xff]  }
 0xa33   : > { %v2287_v51 = vpop.xlane.xlu0 %2286 }
 0xa34   : > { %v2290_v53 = vmul.f32 0.0078125, %v2287_v51 }
 0xa36   : > { %v2292_v54 = vadd.f32 1e-05, %v2290_v53 }
 0xa37   : > { %v2289_v56 = vpop.xlane.xlu0 %2288 }
 0xa38   : > { %4155 = vrsqrt.f32 %v2292_v54  ;;  %v2291_v52 = vmul.f32 0.0078125, %v2289_v56 }
 0xa3a   : > { %v2293_v57 = vadd.f32 1e-05, %v2291_v52 }
 0xa3c   : > { %4157 = vrsqrt.f32 %v2293_v57 }
 0xa42   : > { %v4156_v58 = vpop.eup %4155 }
 0xa43   : > { %v2296_v55 = vmul.f32 %v4156_v58, %v4950_v17  ;;  %v4105_v17 = vld [vmem:[%s4685_s12 + $0x18] sm:$0xff]  }
 0xa45   : > { %v2305_v62 = vmul.f32 %v3527_v59, %v2296_v55 }
 0xa46   : > { %v4158_v60 = vpop.eup %4157 }
 0xa47   : > { %v2297_v61 = vmul.f32 %v4158_v60, %v4952_v21  ;;  %v4996_v1 = vadd.f32 %v3528_v63, %v2305_v62  ;;  %v4107_v21 = vld [vmem:[%s4685_s12 + $0x60] sm:$0xff]  }
 0xa49   : > { %v2306_v0 = vmul.f32 %v3527_v59, %v2297_v61 }
 0xa4b   : > { %v4998_v3 = vadd.f32 %v3528_v63, %v2306_v0 }
 0xa4d   : > { %v2316_v5 = vpack.c.bf16 %v4998_v3, %v4996_v1 }
 0xa4f   : > { %2564 = vmatmul.mubr.bf16.vlgmr.msra.gmra.mrb[44].mxu1 %v2316_v5  ;;  %2607 = vmatmul.mubr.bf16.vlgmr.msra.gmra.mrb[32].mxu0 %v2316_v5 }
 0xa50   : > { %3671 = vmatpush3.bf16.msra.mxu1 %v4093_v19  ;;  %3693 = vmatpush3.bf16.msra.mxu0 %v4094_v4 }
 0xa51   : > { %3672 = vmatprep.subr.bf16.mxu1 %v4095_v6  ;;  %3694 = vmatprep.subr.bf16.mxu0 %v4096_v7 }
 0xa54   : > { %3673 = vmatpush3.bf16.msra.mxu1 %v4097_v10  ;;  %3695 = vmatpush3.bf16.msra.mxu0 %v4098_v11  ;;  %v3561_v10 = vld [vmem:[%s888_s30] ss:$0 sm:$0xff] }
 0xa55   : > { %3674 = vmatprep.subr.bf16.mxu1 %v4099_v12  ;;  %3696 = vmatprep.subr.bf16.mxu0 %v4100_v13 }
 0xa58   : > { %3675 = vmatpush3.bf16.msra.mxu1 %v4101_v14  ;;  %3697 = vmatpush3.bf16.msra.mxu0 %v4102_v15 }
 0xa59   : > { %3676 = vmatprep.subr.bf16.mxu1 %v4103_v16  ;;  %3698 = vmatprep.subr.bf16.mxu0 %v4104_v8 }
 0xa5c   : > { %3677 = vmatpush3.bf16.msra.mxu1 %v4105_v17  ;;  %3699 = vmatpush3.bf16.msra.mxu0 %v4106_v18 }
 0xa5d   : > { %3678 = vmatprep.subr.bf16.mxu1 %v4107_v21  ;;  %3700 = vmatprep.subr.bf16.mxu0 %v4108_v22 }
 0xa60   : > { %3679 = vmatpush3.bf16.msra.mxu1 %v4109_v9  ;;  %3701 = vmatpush3.bf16.msra.mxu0 %v4110_v23 }
 0xa61   : > { %3680 = vmatprep.subr.bf16.mxu1 %v4111_v24  ;;  %3702 = vmatprep.subr.bf16.mxu0 %v4112_v25 }
 0xa64   : > { %3681 = vmatpush3.bf16.msra.mxu1 %v4113_v26  ;;  %3703 = vmatpush3.bf16.msra.mxu0 %v4114_v27 }
 0xa65   : > { %3682 = vmatprep.subr.bf16.mxu1 %v4115_v28  ;;  %3704 = vmatprep.subr.bf16.mxu0 %v4116_v29 }
 0xa68   : > { %3683 = vmatpush3.bf16.msra.mxu1 %v4117_v30  ;;  %3705 = vmatpush3.bf16.msra.mxu0 %v4118_v31 }
 0xa69   : > { %3684 = vmatprep.subr.bf16.mxu1 %v4119_v32  ;;  %3706 = vmatprep.subr.bf16.mxu0 %v4120_v33 }
 0xa6c   : > { %3685 = vmatpush3.bf16.msra.mxu1 %v4121_v34  ;;  %3707 = vmatpush3.bf16.msra.mxu0 %v4122_v35 }
 0xb22   : > { %v2565_v42 = vpop.f32.mrb[44].mxu1  ;;  %v2608_v20 = vpop.f32.mrb[32].mxu0 }
 0xb23   : > { %v2566_v43 = vadd.f32 %v2565_v42, %v2354_v38  ;;  %v2609_v44 = vadd.f32 %v2608_v20, %v2362_v39  ;;  %v2567_v45 = vpop.f32.mrb[45].mxu1  ;;  %v2610_v46 = vpop.f32.mrb[33].mxu0  ;;  %v3595_v20 = vld [vmem:[%s894_s24] ss:$0 sm:$0xff] }
 0xb24   : > { %v2568_v49 = vadd.f32 %v2567_v45, %v2358_v40  ;;  %v2611_v51 = vadd.f32 %v2610_v46, %v2366_v41  ;;  %v2569_v53 = vpop.f32.mrb[46].mxu1  ;;  %v2612_v54 = vpop.f32.mrb[34].mxu0 }
 0xb25   : > { %v2570_v56 = vadd.f32 %v2569_v53, %v2354_v38  ;;  %v2613_v52 = vadd.f32 %v2612_v54, %v2362_v39  ;;  %v2571_v50 = vpop.f32.mrb[47].mxu1  ;;  %v2614_v57 = vpop.f32.mrb[35].mxu0  ;;  %v2617_v55 = vmax.f32 %v2566_v43, 0.0  ;;  %v2619_v47 = vmax.f32 %v2609_v44, 0.0 }
 0xb26   : > { %v2572_v58 = vadd.f32 %v2571_v50, %v2358_v40  ;;  %v2615_v2 = vadd.f32 %v2614_v57, %v2366_v41  ;;  %v2618_v60 = vmax.f32 %v2568_v49, 0.0  ;;  %v2620_v61 = vmax.f32 %v2611_v51, 0.0  ;;  %v3594_v40 = vld [vmem:[%s891_s5] ss:$0 sm:$0xff]  ;;  %s5199_s5 = sld [smem:[#allocation27_spill]] (!%p3596_p7) }
 0xb27   : > { %v2621_v48 = vmax.f32 %v2570_v56, 0.0  ;;  %v2623_v59 = vmax.f32 %v2613_v52, 0.0  ;;  %v4340_v53 = vmov (!%p3596_p7), 0.0  }
 0xb28   : > { %v2622_v62 = vmax.f32 %v2572_v58, 0.0  ;;  %v2624_v63 = vmax.f32 %v2615_v2, 0.0  ;;  %3870 = vmatprep.subr.bf16.mxu0 (!%p3596_p7), %v4340_v53  ;;  %3890 = vmatprep.subr.bf16.mxu1 (!%p3596_p7), %v4340_v53 }
 0xb29   : > { %v2625_v0 = vpack.c.bf16 %v2621_v48, %v2617_v55  ;;  %v2627_v19 = vpack.c.bf16 %v2623_v59, %v2619_v47  ;;  %v4173_v47 = vld [vmem:[%s5200_s3] sm:$0xff] (!%p3596_p7)  }
 0xb2a   : > { %v2626_v4 = vpack.c.bf16 %v2622_v62, %v2618_v60  ;;  %v2628_v5 = vpack.c.bf16 %v2624_v63, %v2620_v61  ;;  %v4174_v61 = vld [vmem:[%s5201_s16 + $0x8] sm:$0xff] (!%p3596_p7)  }
 0xb2c   : > { %2924 = vmatprep.mubr.bf16.mxu1 %v2626_v4  ;;  %2965 = vmatprep.mubr.bf16.mxu0 %v2628_v5  ;;  %v4165_v51 = vld [vmem:[%s5199_s5] sm:$0xff] (!%p3596_p7)   ;;  %v4166_v54 = vld [vmem:[%s5199_s5 + $0x8] sm:$0xff] (!%p3596_p7)   ;;  %v4167_v58 = vld [vmem:[%s5199_s5 + $0x10] sm:$0xff] (!%p3596_p7)  }
 0xb2d   : > { %2925 = vmatmul.mubr.bf16.vlgmr.msra.gmra.mrb[48].mxu1 %v2625_v0  ;;  %2966 = vmatmul.mubr.bf16.vlgmr.msra.gmra.mrb[36].mxu0 %v2627_v19  ;;  %v4168_v48 = vld [vmem:[%s5199_s5 + $0x18] sm:$0xff] (!%p3596_p7)   ;;  %v4169_v62 = vld [vmem:[%s5199_s5 + $0x20] sm:$0xff] (!%p3596_p7)   ;;  %v4170_v19 = vld [vmem:[%s5199_s5 + $0x28] sm:$0xff] (!%p3596_p7)  }
 0xb2e   : > { %3871 = vmatpush3.bf16.msra.mxu0 (!%p3596_p7), %v4165_v51  ;;  %3886 = vmatprep.mubr.msk.bf16.mxu0 (!%p3596_p7), %vm4341_vm8, %v4340_v53 }
 0xb2f   : > { %3872 = vmatprep.subr.bf16.mxu0 (!%p3596_p7), %v4340_v53  ;;  %3898 = vmatprep.mubr.msk.bf16.mxu1 (!%p3596_p7), %vm4341_vm8, %v4340_v53 }
 0xb30   : > { %3891 = vmatpush3.bf16.msra.mxu1 (!%p3596_p7), %v4173_v47 }
 0xb31   : > { %3892 = vmatprep.subr.bf16.mxu1 (!%p3596_p7), %v4340_v53 }
 0xb32   : > { %3873 = vmatpush3.bf16.msra.mxu0 (!%p3596_p7), %v4166_v54 }
 0xb33   : > { %3874 = vmatprep.subr.bf16.mxu0 (!%p3596_p7), %v4340_v53 }
 0xb34   : > { %3893 = vmatpush3.bf16.msra.mxu1 (!%p3596_p7), %v4174_v61 }
 0xb35   : > { %3894 = vmatprep.subr.bf16.mxu1 (!%p3596_p7), %v4340_v53 }
 0xb36   : > { %3875 = vmatpush3.bf16.msra.mxu0 (!%p3596_p7), %v4167_v58 }
 0xb37   : > { %3876 = vmatprep.subr.bf16.mxu0 (!%p3596_p7), %v4340_v53 }
 0xb3a   : > { %3877 = vmatpush3.bf16.msra.mxu0 (!%p3596_p7), %v4168_v48 }
 0xb3b   : > { %3878 = vmatprep.subr.bf16.mxu0 (!%p3596_p7), %v4340_v53 }
 0xb3e   : > { %3879 = vmatpush3.bf16.msra.mxu0 (!%p3596_p7), %v4169_v62 }
 0xb3f   : > { %3880 = vmatprep.subr.bf16.mxu0 (!%p3596_p7), %v4340_v53 }
 0xb42   : > { %3881 = vmatpush3.bf16.msra.mxu0 (!%p3596_p7), %v4170_v19 }
 0xb43   : > { %3882 = vmatprep.subr.bf16.mxu0 (!%p3596_p7), %v4340_v53 }
 0xc00   : > { %v3686_v6 = vpop.f32.mrb[48].mxu1  ;;  %v3708_v7 = vpop.f32.mrb[36].mxu0 }
 0xc01   : > { %v3687_v11 = vpop.f32.mrb[49].mxu1  ;;  %v3709_v12 = vpop.f32.mrb[37].mxu0 }
 0xc02   : > { %v3688_v13 = vadd.f32 %v3687_v11, %v3686_v6  ;;  %v3710_v14 = vadd.f32 %v3709_v12, %v3708_v7  ;;  %v3689_v15 = vpop.f32.mrb[50].mxu1  ;;  %v3711_v16 = vpop.f32.mrb[38].mxu0  ;;  %v4171_v6 = vld [vmem:[%s5199_s5 + $0x30] sm:$0xff] (!%p3596_p7)   ;;  %v4172_v11 = vld [vmem:[%s5199_s5 + $0x38] sm:$0xff] (!%p3596_p7)  }
 0xc03   : > { %v3690_v8 = vpop.f32.mrb[51].mxu1  ;;  %v3712_v17 = vpop.f32.mrb[39].mxu0  ;;  %3883 = vmatpush3.bf16.msra.mxu0 (!%p3596_p7), %v4171_v6 }
 0xc04   : > { %v2927_v18 = vadd.f32 %v3688_v13, %v3561_v10  ;;  %v3691_v21 = vadd.f32 %v3690_v8, %v3689_v15  ;;  %v3713_v22 = vadd.f32 %v3712_v17, %v3711_v16  ;;  %3884 = vmatprep.subr.bf16.mxu0 (!%p3596_p7), %v4340_v53  ;;  %v4176_v15 = vld [vmem:[%s5201_s16 + $0x18] sm:$0xff] (!%p3596_p7)   ;;  %v3597_v16 = vld [vmem:[%s5202_s29] ss:$0 sm:$0xff] (!%p3596_p7) }
 0xc06   : > { %v2968_v9 = vadd.f32 %v3710_v14, %v2927_v18  ;;  %v2930_v23 = vadd.f32 %v3691_v21, %v3561_v10  ;;  %v4175_v14 = vld [vmem:[%s5201_s16 + $0x10] sm:$0xff] (!%p3596_p7)  }
 0xc07   : > { %3885 = vmatpush3.bf16.msra.mxu0 (!%p3596_p7), %v4172_v11  ;;  %3895 = vmatpush3.bf16.msra.mxu1 (!%p3596_p7), %v4175_v14 }
 0xc08   : > { %v2971_v24 = vadd.f32 %v3713_v22, %v2930_v23  ;;  %v2974_v25 = vadd.f32 %v2968_v9, %v4996_v1  ;;  %3896 = vmatprep.subr.bf16.mxu1 (!%p3596_p7), %v4340_v53 }
 0xc0a   : > { %2976 = vadd.xlane.f32.xlu1 %v2974_v25  ;;  %v2975_v26 = vadd.f32 %v2971_v24, %v4998_v3 }
 0xc0b   : > { %3897 = vmatpush3.bf16.msra.mxu1 (!%p3596_p7), %v4176_v15 }
 0xc0c   : > { %2978 = vadd.xlane.f32.xlu0 %v2975_v26 }
 0xc97   : > { %v2977_v27 = vpop.xlane.xlu1 %2976 }
 0xc98   : > { %v2980_v28 = vmul.f32 0.0078125, %v2977_v27 }
 0xc99   : > { %v2979_v29 = vpop.xlane.xlu0 %2978 }
 0xc9a   : > { %v2982_v30 = vsub.f32 %v2974_v25, %v2980_v28  ;;  %v2981_v31 = vmul.f32 0.0078125, %v2979_v29  ;;  %v3606_v25 = vld [vmem:[#allocation3] ss:$0 sm:$0xff] (!%p3596_p7) }
 0xc9c   : > { %v2983_v32 = vsub.f32 %v2975_v26, %v2981_v31  ;;  %v2984_v33 = vmul.f32 %v2982_v30, %v2982_v30 }
 0xc9e   : > { %2986 = vadd.xlane.f32.xlu1 %v2984_v33  ;;  %v2985_v34 = vmul.f32 %v2983_v32, %v2983_v32 }
 0xca0   : > { %2988 = vadd.xlane.f32.xlu0 %v2985_v34 }
 0xd2b   : > { %v2987_v35 = vpop.xlane.xlu1 %2986 }
 0xd2c   : > { %v2990_v36 = vmul.f32 0.0078125, %v2987_v35 }
 0xd2d   : > { %v2989_v37 = vpop.xlane.xlu0 %2988 }
 0xd2e   : > { %v2992_v1 = vadd.f32 1e-05, %v2990_v36  ;;  %v2991_v38 = vmul.f32 0.0078125, %v2989_v37 }
 0xd30   : > { %4159 = vrsqrt.f32 %v2992_v1  ;;  %v2993_v3 = vadd.f32 1e-05, %v2991_v38 }
 0xd32   : > { %4161 = vrsqrt.f32 %v2993_v3 }
 0xd3a   : > { %v4160_v39 = vpop.eup %4159 }
 0xd3b   : > { %v2996_v41 = vmul.f32 %v4160_v39, %v2982_v30 }
 0xd3c   : > { %v4162_v42 = vpop.eup %4161 }
 0xd3d   : > { %v3005_v43 = vmul.f32 %v3594_v40, %v2996_v41  ;;  %v2997_v44 = vmul.f32 %v4162_v42, %v2983_v32  ;;  %3021 = sbr.rel (%p3596_p7) target bundleno = 3846 (0xf06), region = 120 }
 0xd3f   : > { %v3014_v45 = vadd.f32 %v3595_v20, %v3005_v43  ;;  %v3006_v46 = vmul.f32 %v3594_v40, %v2997_v44 }
 0xd41   : > { %3016 = vst [vmem:[#allocation2] sm:$0xff] %v3014_v45  ;;  %v3015_v49 = vadd.f32 %v3595_v20, %v3006_v46  ;;  %v3022_v56 = vrot.slane (!%p3596_p7), %v3014_v45, 4 }
 0xd43   : > { %3017 = vst [vmem:[#allocation2 + $0x8] sm:$0xff] %v3015_v49  ;;  %v3030_v52 = vrot.slane (!%p3596_p7), %v3015_v49, 4  ;;  %v3023_v50 = vadd.f32 (!%p3596_p7), %v3022_v56, %v3014_v45 }
 0xd45   : > { %v3031_v57 = vadd.f32 %v3030_v52, %v3015_v49  ;;  %v3024_v2 = vrot.slane %v3023_v50, 2 }
 0xd47   : > { %v3032_v55 = vrot.slane %v3031_v57, 2  ;;  %v3025_v59 = vadd.f32 %v3024_v2, %v3023_v50 }
 0xd49   : > { %v3033_v60 = vadd.f32 %v3032_v55, %v3031_v57  ;;  %v3026_v63 = vrot.slane %v3025_v59, 1 }
 0xd4b   : > { %v3034_v0 = vrot.slane %v3033_v60, 1  ;;  %v3027_v4 = vadd.f32 %v3026_v63, %v3025_v59 }
 0xd4d   : > { %v3035_v5 = vadd.f32 %v3034_v0, %v3033_v60  ;;  %v3029_v7 = vmul.f32 0.125, %v3027_v4 }
 0xd4f   : > { %v3036_v10 = vmul.f32 0.125, %v3035_v5 }
 0xd51   : > { %v3038_v12 = vsel %vm3037_vm9, %v3029_v7, %v3036_v10 }
 0xd52   : > { %v3039_v13 = vpack.c.bf16 %v3038_v12, %v3038_v12 }
 0xd54   : > { %3887 = vmatmul.mubr.bf16.vlgmr.msra.gmra.mrb[0].mxu0 %v3039_v13 }
 0xe27   : > { %v3145_v8 = vpop.f32.mrb[0].mxu0 }
 0xe28   : > { %v3146_v17 = vadd.f32 %v3597_v16, %v3145_v8  ;;  %v3888_v18 = vpop.f32.mrb[1].mxu0 }
 0xe29   : > { %v3148_v21 = vpop.f32.mrb[2].mxu0 }
 0xe2a   : > { %vm3151_vm10 = vcmp.gt.f32.partialorder %v3146_v17, 0.0  ;;  %v3152_v22 = vmul.f32 0.2, %v3146_v17  ;;  %v3889_v9 = vpop.f32.mrb[3].mxu0 }
 0xe2c   : > { %v3153_v23 = vsel %vm3151_vm10, %v3146_v17, %v3152_v22 }
 0xe2d   : > { %v3154_v24 = vpack.c.bf16 %v3153_v23, %v3153_v23 }
 0xe2f   : > { %3899 = vmatmul.mubr.msk.bf16.vlgmr.msra.gmra.mrb[0].mxu1 %vm1697_vm6, %v3154_v24 }
 0xf02   : > { %v3231_v26 = vpop.f32.mrb[0].mxu1 }
 0xf03   : > { %v3232_v27 = vadd.f32 %v3606_v25, %v3231_v26  ;;  %v3900_v28 = vpop.f32.mrb[1].mxu1 }
 0xf04   : > { %v3234_v29 = vpop.f32.mrb[2].mxu1 }
 0xf05   : > { %3238 = vst.msk [vmem:[%s5203_s18] sm:$0x3] %vm3237_vm11, %v3232_v27  ;;  %v3901_v30 = vpop.f32.mrb[3].mxu1 }
 0xf06 PF: > { %s38_s26 = sadd.s32 1, %s4321_s26   ;;  %s5204_s23 = sld [smem:[#allocation11_spill]] }
 0xf07   : > { %p35_p13 = scmp.ge.s32.totalorder %s38_s26, 4   ;;  %s5205_s24 = sld [smem:[#allocation12_spill]] }
 0xf08   : > { %s5206_s2 = sld [smem:[#allocation15_spill]]  ;;  %s5207_s25 = sld [smem:[#allocation13_spill]] }
 0xf09   : > { %s5208_s3 = sld [smem:[#allocation14_spill]]  ;;  %37 = sbr.rel (!%p35_p13) target bundleno = 22 (0x16), region = 202 }
 0xf10   :  { %3258 = vsyncpa [#allocation5], 1 }
 0xf11   :  { %3260 = vsyncpa [#allocation5 + $0x1], 1 }
 0xf12   :  { %3261 = vsyncpa [#allocation7], 1 }
 0xf13   :  { %3263 = vsyncpa [#allocation7 + $0x1], 1 }

</bundles_post_ra>
